<compile_context>
chip_gen: v5e
topology: v5e:2x2
jax: 0.10.0
libtpu: 0.0.40
codegen_flags: <defaults>
</compile_context>

<pallas_src>
import functools

import jax
import jax.numpy as jnp
from jax.experimental import pallas as pl
from jax.experimental.pallas import tpu as pltpu


# ----------------------------------------------------------------------------
# Fused forward kernel (grid=(1,), everything resident in VMEM).
# ----------------------------------------------------------------------------
def _fused_forward_kernel(
    ids_ref, emb_ref, wih_ref, bih_ref, whh1_ref, whh2_ref,
    hw_ref, hb_ref, noise_ref, l2h_w_ref, l2h_b_ref, o2v_w_ref, o2v_b_ref,
    probs_ref, heads_ref, z_ref,
    gx1_scr, gx2_scr, hs2_scr,
    *, seq_len, batch, hidden, latent):
  T, B, H, L = seq_len, batch, hidden, latent
  TB = T * B
  Vp = emb_ref.shape[0]

  # ---- Embedding (one-hot MXU gather) + BOTH hoisted input projections ----
  # embW = emb_pad @ [Wih1 | Wih2]  -> (Vp, 8H); then gx = onehot @ embW + b.
  embW = jnp.dot(emb_ref[...], wih_ref[...], preferred_element_type=jnp.float32)
  ids = ids_ref[...]                                           # (TB, 1) int32
  iota = jax.lax.broadcasted_iota(jnp.int32, (TB, Vp), 1)
  onehot = (iota == ids).astype(jnp.float32)                   # (TB, Vp)
  gx = jnp.dot(onehot, embW, preferred_element_type=jnp.float32) + bih_ref[...]
  gx1_scr[...] = gx[:, :4 * H]                                 # LSTM1 x-projection
  gx2_scr[...] = gx[:, 4 * H:]                                 # LSTM2 x-projection

  def cell(gates, c):
    # PyTorch gate order (i, f, g, o). Two transcendental invocations per step:
    # one full-width sigmoid and one full-width tanh over the 128-lane gate
    # vreg; the unused lanes are free filler (same vreg).
    sg = jax.nn.sigmoid(gates)
    tg = jnp.tanh(gates)
    i_g = sg[:, 0 * H:1 * H]
    f_g = sg[:, 1 * H:2 * H]
    g_g = tg[:, 2 * H:3 * H]
    o_g = sg[:, 3 * H:4 * H]
    c_new = f_g * c + i_g * g_g
    h_new = o_g * jnp.tanh(c_new)
    return h_new, c_new

  zeros_bh = jnp.zeros((B, H), jnp.float32)

  # ---- LSTM 1: only the final hidden state is needed (no per-step stores) --
  def step1(t, carry):
    h, c = carry
    row = pl.multiple_of(t * B, B)
    gates = gx1_scr[pl.ds(row, B), :] + jnp.dot(
        h, whh1_ref[...], preferred_element_type=jnp.float32)
    return cell(gates, c)

  h1, _ = jax.lax.fori_loop(0, T, step1, (zeros_bh, zeros_bh), unroll=True)

  # ---- Fused heads: [smean|cmean|slogv|clogv|label|pad], reparam, latent2hidden
  heads = jnp.dot(h1, hw_ref[...], preferred_element_type=jnp.float32) + hb_ref[...]
  heads_ref[...] = heads
  mean = heads[:, 0:L]
  logv = heads[:, L:2 * L]
  z = noise_ref[...] * jnp.exp(0.5 * logv) + mean
  z_ref[...] = z
  h2_0 = (jnp.dot(z, l2h_w_ref[...], preferred_element_type=jnp.float32)
          + l2h_b_ref[...])                                    # LSTM2 initial h

  # ---- LSTM 2: all timesteps kept in VMEM scratch ----
  def step2(t, carry):
    h, c = carry
    row = pl.multiple_of(t * B, B)
    gates = gx2_scr[pl.ds(row, B), :] + jnp.dot(
        h, whh2_ref[...], preferred_element_type=jnp.float32)
    h_new, c_new = cell(gates, c)
    hs2_scr[pl.ds(row, B), :] = h_new
    return h_new, c_new

  jax.lax.fori_loop(0, T, step2, (h2_0, zeros_bh), unroll=True)

  # ---- outputs2vocab + exp(log_softmax) == softmax, V padded to 128 lanes --
  logits = (jnp.dot(hs2_scr[...], o2v_w_ref[...], preferred_element_type=jnp.float32)
            + o2v_b_ref[...])            # padded vocab lanes carry -1e30 bias
  m = jnp.max(logits, axis=-1, keepdims=True)
  e = jnp.exp(logits - m)
  probs_ref[...] = e * pl.reciprocal(jnp.sum(e, axis=-1, keepdims=True),
                                     approx=True)


def _full_spec(*shape):
  nd = len(shape)
  return pl.BlockSpec(shape, lambda i, _nd=nd: (0,) * _nd)


def _fused_forward_call(ids_flat, emb_pad, wih_cat, bih_cat, whh1, whh2,
                        heads_w, heads_b, noise, l2h_w, l2h_b, o2v_w, o2v_b,
                        *, seq_len, batch, hidden, latent):
  TB = seq_len * batch
  Vp, E = emb_pad.shape
  H, L = hidden, latent
  Np = heads_w.shape[1]
  Vop = o2v_w.shape[1]
  kernel = functools.partial(_fused_forward_kernel, seq_len=seq_len,
                             batch=batch, hidden=H, latent=L)
  return pl.pallas_call(
      kernel,
      out_shape=(
          jax.ShapeDtypeStruct((TB, Vop), jnp.float32),   # padded softmax probs
          jax.ShapeDtypeStruct((batch, Np), jnp.float32),  # mean | logv | label
          jax.ShapeDtypeStruct((batch, L), jnp.float32),   # final_z
      ),
      grid=(1,),
      in_specs=[
          _full_spec(TB, 1),          # ids
          _full_spec(Vp, E),          # embedding table (row-padded)
          _full_spec(E, 8 * H),       # [Wih1 | Wih2]
          _full_spec(1, 8 * H),       # [b1 | b2]
          _full_spec(H, 4 * H),       # Whh1
          _full_spec(H, 4 * H),       # Whh2
          _full_spec(H, Np),          # fused head weights (lane-padded)
          _full_spec(1, Np),          # fused head biases
          _full_spec(batch, L),       # reparam noise
          _full_spec(L, H),           # latent2hidden W
          _full_spec(1, H),           # latent2hidden b
          _full_spec(H, Vop),         # outputs2vocab W (lane-padded)
          _full_spec(1, Vop),         # outputs2vocab b (-1e30 on pad lanes)
      ],
      out_specs=(
          _full_spec(TB, Vop),
          _full_spec(batch, Np),
          _full_spec(batch, L),
      ),
      scratch_shapes=[
          pltpu.VMEM((TB, 4 * H), jnp.float32),   # gx1
          pltpu.VMEM((TB, 4 * H), jnp.float32),   # gx2
          pltpu.VMEM((TB, H), jnp.float32),       # LSTM2 hidden states
      ],
      compiler_params=pltpu.CompilerParams(dimension_semantics=("arbitrary",)),
  )(ids_flat, emb_pad, wih_cat, bih_cat, whh1, whh2, heads_w, heads_b,
    noise, l2h_w, l2h_b, o2v_w, o2v_b)


# ----------------------------------------------------------------------------
# Model: parameter construction + forward
# ----------------------------------------------------------------------------
def init_params(key, *, vocab_size, embedding_length, hidden_size, output_size,
                latent_size):
  ks = iter(jax.random.split(key, 32))
  n = lambda shape, s=0.1: (s * jax.random.normal(next(ks), shape)).astype(jnp.float32)
  H, E, V, L = hidden_size, embedding_length, vocab_size, latent_size
  p = {
      "emb": n((V, E), 0.5),
      # LSTM weights stored transposed vs torch ([in, 4H]), gate order i,f,g,o.
      # "b" is the sum b_ih + b_hh of the torch parameters.
      "lstm1_wih": n((E, 4 * H)), "lstm1_whh": n((H, 4 * H)), "lstm1_b": n((4 * H,)),
      "lstm2_wih": n((E, 4 * H)), "lstm2_whh": n((H, 4 * H)), "lstm2_b": n((4 * H,)),
      # Linear layers stored as [in, out].
      "label_w": n((H, output_size)), "label_b": n((output_size,)),
      "smean_w": n((H, L // 4)), "smean_b": n((L // 4,)),
      "slogv_w": n((H, L // 4)), "slogv_b": n((L // 4,)),
      "cmean_w": n((H, 3 * L // 4)), "cmean_b": n((3 * L // 4,)),
      "clogv_w": n((H, 3 * L // 4)), "clogv_b": n((3 * L // 4,)),
      "l2h_w": n((L, H)), "l2h_b": n((H,)),
      "o2v_w": n((H, V)), "o2v_b": n((V,)),
  }
  return p


def lstm_classifier2_forward(params, input_sentence, *, hidden_size, latent_size,
                             noise_key):
  """input_sentence: int32 [B, T] token ids.  Returns
  (final_tokens [B,T,V], final_mean [B,L], final_logv [B,L], final_z [B,L],
   style_preds [B,output_size])."""
  B, T = input_sentence.shape
  H, L = hidden_size, latent_size
  out_size = params["label_w"].shape[1]
  V, E = params["emb"].shape
  B_pad = ((B + 7) // 8) * 8                     # full sublane vreg
  Vp = ((V + 127) // 128) * 128                  # 128-lane padded vocab

  # Token ids: time-major, batch padded, flattened to a (T*Bp, 1) int column.
  ids_tb = jnp.pad(jnp.transpose(input_sentence, (1, 0)), ((0, 0), (0, B_pad - B)))
  ids_flat = ids_tb.reshape(T * B_pad, 1).astype(jnp.int32)

  # ---- weight prep (cheap XLA glue on tiny weight tensors) ----
  emb_pad = jnp.pad(params["emb"], ((0, Vp - V), (0, 0)))
  wih_cat = jnp.concatenate([params["lstm1_wih"], params["lstm2_wih"]], axis=1)
  bih_cat = jnp.concatenate([params["lstm1_b"], params["lstm2_b"]],
                            axis=0).reshape(1, 8 * H)

  # Column layout: [smean(L/4)|cmean(3L/4)|slogv(L/4)|clogv(3L/4)|label|pad]
  # so that heads[:, :L] == cat(style_mean, content_mean) as in the PyTorch ref.
  heads_w = jnp.concatenate([params["smean_w"], params["cmean_w"],
                             params["slogv_w"], params["clogv_w"],
                             params["label_w"]], axis=1)
  heads_b = jnp.concatenate([params["smean_b"], params["cmean_b"],
                             params["slogv_b"], params["clogv_b"],
                             params["label_b"]], axis=0)
  n_cols = heads_w.shape[1]
  n_pad = ((n_cols + 127) // 128) * 128
  heads_w = jnp.pad(heads_w, ((0, 0), (0, n_pad - n_cols)))
  heads_b = jnp.pad(heads_b, (0, n_pad - n_cols)).reshape(1, n_pad)

  o2v_w = jnp.pad(params["o2v_w"], ((0, 0), (0, Vp - V)))
  o2v_b = jnp.pad(params["o2v_b"], (0, Vp - V),
                  constant_values=-1e30).reshape(1, Vp)

  noise = jax.random.normal(noise_key, (B_pad, L), jnp.float32)

  # TODO(synk): embedding_dropout (p=0.5) on the LSTM2 input is stochastic;
  # treated as eval-mode identity here.
  probs_p, heads, z_p = _fused_forward_call(
      ids_flat, emb_pad, wih_cat, bih_cat,
      params["lstm1_whh"], params["lstm2_whh"],
      heads_w, heads_b, noise, params["l2h_w"],
      params["l2h_b"].reshape(1, H), o2v_w, o2v_b,
      seq_len=T, batch=B_pad, hidden=H, latent=L)

  final_mean = heads[:B, 0:L]
  final_logv = heads[:B, L:2 * L]
  style_preds = heads[:B, 2 * L:2 * L + out_size]
  final_z = z_p[:B]
  probs = probs_p.reshape(T, B_pad, Vp)[:, :B, :V]       # drop pads once
  final_tokens = jnp.transpose(probs, (1, 0, 2))         # (B, T, V)

  return final_tokens, final_mean, final_logv, final_z, style_preds


# ----------------------------------------------------------------------------
if __name__ == "__main__":
  batch_size = 4
  output_size = 2
  hidden_size = 32
  vocab_size = 50
  embedding_length = 16
  seq_len = 8
  latent_size = 40  # fixed inside the PyTorch module

  key = jax.random.PRNGKey(0)
  k_params, k_inp, k_noise = jax.random.split(key, 3)

  params = init_params(k_params, vocab_size=vocab_size,
                       embedding_length=embedding_length,
                       hidden_size=hidden_size, output_size=output_size,
                       latent_size=latent_size)

  input_sentence = jax.random.randint(k_inp, (batch_size, seq_len), 0, vocab_size,
                                      dtype=jnp.int32)

  fwd = jax.jit(functools.partial(lstm_classifier2_forward,
                                  hidden_size=hidden_size,
                                  latent_size=latent_size))
  outs = fwd(params, input_sentence, noise_key=k_noise)
  outs = jax.block_until_ready(outs)

  final_tokens, final_mean, final_logv, final_z, style_preds = outs
  assert final_tokens.shape == (batch_size, seq_len, vocab_size)
  assert final_mean.shape == (batch_size, latent_size)
  assert final_logv.shape == (batch_size, latent_size)
  assert final_z.shape == (batch_size, latent_size)
  assert style_preds.shape == (batch_size, output_size)
  assert bool(jnp.all(jnp.isfinite(final_tokens)))
  assert bool(jnp.all(jnp.isfinite(final_mean)))
  assert bool(jnp.all(jnp.isfinite(final_z)))
  # softmax rows must sum to ~1 (padded vocab lanes excluded; tolerance loose
  # because the denominator uses the approximate EUP reciprocal).
  assert bool(jnp.all(jnp.abs(jnp.sum(final_tokens, axis=-1) - 1.0) < 5e-3))

  print("KERNEL_OK")
</pallas_src>

<mosaic_0001>
module attributes {stable_mosaic.version = 11 : i64} {
  func.func @_fused_forward_kernel(%arg0: i32, %arg1: memref<64x1xi32, #tpu.memory_space<vmem>>, %arg2: memref<128x16xf32, #tpu.memory_space<vmem>>, %arg3: memref<16x256xf32, #tpu.memory_space<vmem>>, %arg4: memref<1x256xf32, #tpu.memory_space<vmem>>, %arg5: memref<32x128xf32, #tpu.memory_space<vmem>>, %arg6: memref<32x128xf32, #tpu.memory_space<vmem>>, %arg7: memref<32x128xf32, #tpu.memory_space<vmem>>, %arg8: memref<1x128xf32, #tpu.memory_space<vmem>>, %arg9: memref<8x40xf32, #tpu.memory_space<vmem>>, %arg10: memref<40x32xf32, #tpu.memory_space<vmem>>, %arg11: memref<1x32xf32, #tpu.memory_space<vmem>>, %arg12: memref<32x128xf32, #tpu.memory_space<vmem>>, %arg13: memref<1x128xf32, #tpu.memory_space<vmem>>, %arg14: memref<64x128xf32, #tpu.memory_space<vmem>>, %arg15: memref<8x128xf32, #tpu.memory_space<vmem>>, %arg16: memref<8x40xf32, #tpu.memory_space<vmem>>, %arg17: memref<64x128xf32, #tpu.memory_space<vmem>>, %arg18: memref<64x128xf32, #tpu.memory_space<vmem>>, %arg19: memref<64x32xf32, #tpu.memory_space<vmem>>) attributes {dimension_semantics = [#tpu.dimension_semantics<arbitrary>], iteration_bounds = array<i64: 1>, scalar_prefetch = 0 : i64, scratch_operands = 3 : i64, tpu.core_type = #tpu.core_type<tc>, window_params = [{pipeline_mode = #tpu.pipeline_mode<synchronous>, transform_indices = @transform_0, window_bounds = array<i64: 64, 1>}, {pipeline_mode = #tpu.pipeline_mode<synchronous>, transform_indices = @transform_1, window_bounds = array<i64: 128, 16>}, {pipeline_mode = #tpu.pipeline_mode<synchronous>, transform_indices = @transform_2, window_bounds = array<i64: 16, 256>}, {pipeline_mode = #tpu.pipeline_mode<synchronous>, transform_indices = @transform_3, window_bounds = array<i64: 1, 256>}, {pipeline_mode = #tpu.pipeline_mode<synchronous>, transform_indices = @transform_4, window_bounds = array<i64: 32, 128>}, {pipeline_mode = #tpu.pipeline_mode<synchronous>, transform_indices = @transform_5, window_bounds = array<i64: 32, 128>}, {pipeline_mode = #tpu.pipeline_mode<synchronous>, transform_indices = @transform_6, window_bounds = array<i64: 32, 128>}, {pipeline_mode = #tpu.pipeline_mode<synchronous>, transform_indices = @transform_7, window_bounds = array<i64: 1, 128>}, {pipeline_mode = #tpu.pipeline_mode<synchronous>, transform_indices = @transform_8, window_bounds = array<i64: 8, 40>}, {pipeline_mode = #tpu.pipeline_mode<synchronous>, transform_indices = @transform_9, window_bounds = array<i64: 40, 32>}, {pipeline_mode = #tpu.pipeline_mode<synchronous>, transform_indices = @transform_10, window_bounds = array<i64: 1, 32>}, {pipeline_mode = #tpu.pipeline_mode<synchronous>, transform_indices = @transform_11, window_bounds = array<i64: 32, 128>}, {pipeline_mode = #tpu.pipeline_mode<synchronous>, transform_indices = @transform_12, window_bounds = array<i64: 1, 128>}, {pipeline_mode = #tpu.pipeline_mode<synchronous>, transform_indices = @transform_13, window_bounds = array<i64: 64, 128>}, {pipeline_mode = #tpu.pipeline_mode<synchronous>, transform_indices = @transform_14, window_bounds = array<i64: 8, 128>}, {pipeline_mode = #tpu.pipeline_mode<synchronous>, transform_indices = @transform_15, window_bounds = array<i64: 8, 40>}]} {
    %c0 = arith.constant 0 : index
    %c0_0 = arith.constant 0 : index
    %0 = vector.load %arg2[%c0, %c0_0] : memref<128x16xf32, #tpu.memory_space<vmem>>, vector<128x16xf32>
    %c0_1 = arith.constant 0 : index
    %c0_2 = arith.constant 0 : index
    %1 = vector.load %arg3[%c0_1, %c0_2] : memref<16x256xf32, #tpu.memory_space<vmem>>, vector<16x256xf32>
    %cst = arith.constant dense<0.000000e+00> : vector<128x256xf32>
    %2 = tpu.matmul %0, %1, %cst {dimension_numbers = #tpu.dot_dimension_numbers<[1], [0], [0], [1], [0, 0, 1, 1], [], []>} : vector<128x16xf32>, vector<16x256xf32>, vector<128x256xf32> -> vector<128x256xf32>
    %c0_3 = arith.constant 0 : index
    %c0_4 = arith.constant 0 : index
    %3 = vector.load %arg1[%c0_3, %c0_4] : memref<64x1xi32, #tpu.memory_space<vmem>>, vector<64x1xi32>
    %4 = tpu.iota {dimensions = array<i32: 1>} : vector<64x128xi32>
    %5 = vector.broadcast %3 : vector<64x1xi32> to vector<64x128xi32>
    %6 = arith.cmpi eq, %4, %5 : vector<64x128xi32>
    %7 = arith.extui %6 : vector<64x128xi1> to vector<64x128xi32>
    %8 = arith.sitofp %7 : vector<64x128xi32> to vector<64x128xf32>
    %cst_5 = arith.constant dense<0.000000e+00> : vector<64x256xf32>
    %9 = tpu.matmul %8, %2, %cst_5 {dimension_numbers = #tpu.dot_dimension_numbers<[1], [0], [0], [1], [0, 0, 1, 1], [], []>} : vector<64x128xf32>, vector<128x256xf32>, vector<64x256xf32> -> vector<64x256xf32>
    %c0_6 = arith.constant 0 : index
    %c0_7 = arith.constant 0 : index
    %10 = vector.load %arg4[%c0_6, %c0_7] : memref<1x256xf32, #tpu.memory_space<vmem>>, vector<1x256xf32>
    %11 = vector.broadcast %10 : vector<1x256xf32> to vector<64x256xf32>
    %12 = arith.addf %9, %11 : vector<64x256xf32>
    %13 = vector.extract_strided_slice %12 {offsets = [0, 0], sizes = [64, 128], strides = [1, 1]} : vector<64x256xf32> to vector<64x128xf32>
    %c0_8 = arith.constant 0 : index
    %c0_9 = arith.constant 0 : index
    %14 = vector.load %arg17[%c0_8, %c0_9] : memref<64x128xf32, #tpu.memory_space<vmem>>, vector<64x128xf32>
    tpu.vector_store %arg17[%c0_8, %c0_9], %13 {strides = array<i32>} : memref<64x128xf32, #tpu.memory_space<vmem>>, vector<64x128xf32>,
    %15 = vector.extract_strided_slice %12 {offsets = [0, 128], sizes = [64, 128], strides = [1, 1]} : vector<64x256xf32> to vector<64x128xf32>
    %c0_10 = arith.constant 0 : index
    %c0_11 = arith.constant 0 : index
    %16 = vector.load %arg18[%c0_10, %c0_11] : memref<64x128xf32, #tpu.memory_space<vmem>>, vector<64x128xf32>
    tpu.vector_store %arg18[%c0_10, %c0_11], %15 {strides = array<i32>} : memref<64x128xf32, #tpu.memory_space<vmem>>, vector<64x128xf32>,
    %cst_12 = arith.constant 0.000000e+00 : f32
    %17 = vector.broadcast %cst_12 : f32 to vector<8x32xf32>
    %c0_i32 = arith.constant 0 : i32
    %c8_i32 = arith.constant 8 : i32
    %18 = arith.muli %c0_i32, %c8_i32 : i32
    %19 = tpu.assume_multiple %18, 8 : i32
    %20 = arith.index_cast %19 : i32 to index
    %c0_13 = arith.constant 0 : index
    %21 = vector.load %arg17[%20, %c0_13] : memref<64x128xf32, #tpu.memory_space<vmem>>, vector<8x128xf32>
    %c0_14 = arith.constant 0 : index
    %c0_15 = arith.constant 0 : index
    %22 = vector.load %arg5[%c0_14, %c0_15] : memref<32x128xf32, #tpu.memory_space<vmem>>, vector<32x128xf32>
    %cst_16 = arith.constant dense<0.000000e+00> : vector<8x128xf32>
    %23 = tpu.matmul %17, %22, %cst_16 {dimension_numbers = #tpu.dot_dimension_numbers<[1], [0], [0], [1], [0, 0, 1, 1], [], []>} : vector<8x32xf32>, vector<32x128xf32>, vector<8x128xf32> -> vector<8x128xf32>
    %24 = arith.addf %21, %23 : vector<8x128xf32>
    %25 = arith.negf %24 : vector<8x128xf32>
    %26 = math.exp %25 : vector<8x128xf32>
    %cst_17 = arith.constant 1.000000e+00 : f32
    %27 = vector.broadcast %cst_17 : f32 to vector<8x128xf32>
    %28 = arith.addf %27, %26 : vector<8x128xf32>
    %29 = arith.divf %27, %28 : vector<8x128xf32>
    %30 = math.tanh %24 : vector<8x128xf32>
    %31 = vector.extract_strided_slice %29 {offsets = [0, 0], sizes = [8, 32], strides = [1, 1]} : vector<8x128xf32> to vector<8x32xf32>
    %32 = vector.extract_strided_slice %29 {offsets = [0, 32], sizes = [8, 32], strides = [1, 1]} : vector<8x128xf32> to vector<8x32xf32>
    %33 = vector.extract_strided_slice %30 {offsets = [0, 64], sizes = [8, 32], strides = [1, 1]} : vector<8x128xf32> to vector<8x32xf32>
    %34 = vector.extract_strided_slice %29 {offsets = [0, 96], sizes = [8, 32], strides = [1, 1]} : vector<8x128xf32> to vector<8x32xf32>
    %35 = arith.mulf %32, %17 : vector<8x32xf32>
    %36 = arith.mulf %31, %33 : vector<8x32xf32>
    %37 = arith.addf %35, %36 : vector<8x32xf32>
    %38 = math.tanh %37 : vector<8x32xf32>
    %39 = arith.mulf %34, %38 : vector<8x32xf32>
    %c1_i32 = arith.constant 1 : i32
    %c8_i32_18 = arith.constant 8 : i32
    %40 = arith.muli %c1_i32, %c8_i32_18 : i32
    %41 = tpu.assume_multiple %40, 8 : i32
    %42 = arith.index_cast %41 : i32 to index
    %c0_19 = arith.constant 0 : index
    %43 = vector.load %arg17[%42, %c0_19] : memref<64x128xf32, #tpu.memory_space<vmem>>, vector<8x128xf32>
    %c0_20 = arith.constant 0 : index
    %c0_21 = arith.constant 0 : index
    %44 = vector.load %arg5[%c0_20, %c0_21] : memref<32x128xf32, #tpu.memory_space<vmem>>, vector<32x128xf32>
    %cst_22 = arith.constant dense<0.000000e+00> : vector<8x128xf32>
    %45 = tpu.matmul %39, %44, %cst_22 {dimension_numbers = #tpu.dot_dimension_numbers<[1], [0], [0], [1], [0, 0, 1, 1], [], []>} : vector<8x32xf32>, vector<32x128xf32>, vector<8x128xf32> -> vector<8x128xf32>
    %46 = arith.addf %43, %45 : vector<8x128xf32>
    %47 = arith.negf %46 : vector<8x128xf32>
    %48 = math.exp %47 : vector<8x128xf32>
    %cst_23 = arith.constant 1.000000e+00 : f32
    %49 = vector.broadcast %cst_23 : f32 to vector<8x128xf32>
    %50 = arith.addf %49, %48 : vector<8x128xf32>
    %51 = arith.divf %49, %50 : vector<8x128xf32>
    %52 = math.tanh %46 : vector<8x128xf32>
    %53 = vector.extract_strided_slice %51 {offsets = [0, 0], sizes = [8, 32], strides = [1, 1]} : vector<8x128xf32> to vector<8x32xf32>
    %54 = vector.extract_strided_slice %51 {offsets = [0, 32], sizes = [8, 32], strides = [1, 1]} : vector<8x128xf32> to vector<8x32xf32>
    %55 = vector.extract_strided_slice %52 {offsets = [0, 64], sizes = [8, 32], strides = [1, 1]} : vector<8x128xf32> to vector<8x32xf32>
    %56 = vector.extract_strided_slice %51 {offsets = [0, 96], sizes = [8, 32], strides = [1, 1]} : vector<8x128xf32> to vector<8x32xf32>
    %57 = arith.mulf %54, %37 : vector<8x32xf32>
    %58 = arith.mulf %53, %55 : vector<8x32xf32>
    %59 = arith.addf %57, %58 : vector<8x32xf32>
    %60 = math.tanh %59 : vector<8x32xf32>
    %61 = arith.mulf %56, %60 : vector<8x32xf32>
    %c2_i32 = arith.constant 2 : i32
    %c8_i32_24 = arith.constant 8 : i32
    %62 = arith.muli %c2_i32, %c8_i32_24 : i32
    %63 = tpu.assume_multiple %62, 8 : i32
    %64 = arith.index_cast %63 : i32 to index
    %c0_25 = arith.constant 0 : index
    %65 = vector.load %arg17[%64, %c0_25] : memref<64x128xf32, #tpu.memory_space<vmem>>, vector<8x128xf32>
    %c0_26 = arith.constant 0 : index
    %c0_27 = arith.constant 0 : index
    %66 = vector.load %arg5[%c0_26, %c0_27] : memref<32x128xf32, #tpu.memory_space<vmem>>, vector<32x128xf32>
    %cst_28 = arith.constant dense<0.000000e+00> : vector<8x128xf32>
    %67 = tpu.matmul %61, %66, %cst_28 {dimension_numbers = #tpu.dot_dimension_numbers<[1], [0], [0], [1], [0, 0, 1, 1], [], []>} : vector<8x32xf32>, vector<32x128xf32>, vector<8x128xf32> -> vector<8x128xf32>
    %68 = arith.addf %65, %67 : vector<8x128xf32>
    %69 = arith.negf %68 : vector<8x128xf32>
    %70 = math.exp %69 : vector<8x128xf32>
    %cst_29 = arith.constant 1.000000e+00 : f32
    %71 = vector.broadcast %cst_29 : f32 to vector<8x128xf32>
    %72 = arith.addf %71, %70 : vector<8x128xf32>
    %73 = arith.divf %71, %72 : vector<8x128xf32>
    %74 = math.tanh %68 : vector<8x128xf32>
    %75 = vector.extract_strided_slice %73 {offsets = [0, 0], sizes = [8, 32], strides = [1, 1]} : vector<8x128xf32> to vector<8x32xf32>
    %76 = vector.extract_strided_slice %73 {offsets = [0, 32], sizes = [8, 32], strides = [1, 1]} : vector<8x128xf32> to vector<8x32xf32>
    %77 = vector.extract_strided_slice %74 {offsets = [0, 64], sizes = [8, 32], strides = [1, 1]} : vector<8x128xf32> to vector<8x32xf32>
    %78 = vector.extract_strided_slice %73 {offsets = [0, 96], sizes = [8, 32], strides = [1, 1]} : vector<8x128xf32> to vector<8x32xf32>
    %79 = arith.mulf %76, %59 : vector<8x32xf32>
    %80 = arith.mulf %75, %77 : vector<8x32xf32>
    %81 = arith.addf %79, %80 : vector<8x32xf32>
    %82 = math.tanh %81 : vector<8x32xf32>
    %83 = arith.mulf %78, %82 : vector<8x32xf32>
    %c3_i32 = arith.constant 3 : i32
    %c8_i32_30 = arith.constant 8 : i32
    %84 = arith.muli %c3_i32, %c8_i32_30 : i32
    %85 = tpu.assume_multiple %84, 8 : i32
    %86 = arith.index_cast %85 : i32 to index
    %c0_31 = arith.constant 0 : index
    %87 = vector.load %arg17[%86, %c0_31] : memref<64x128xf32, #tpu.memory_space<vmem>>, vector<8x128xf32>
    %c0_32 = arith.constant 0 : index
    %c0_33 = arith.constant 0 : index
    %88 = vector.load %arg5[%c0_32, %c0_33] : memref<32x128xf32, #tpu.memory_space<vmem>>, vector<32x128xf32>
    %cst_34 = arith.constant dense<0.000000e+00> : vector<8x128xf32>
    %89 = tpu.matmul %83, %88, %cst_34 {dimension_numbers = #tpu.dot_dimension_numbers<[1], [0], [0], [1], [0, 0, 1, 1], [], []>} : vector<8x32xf32>, vector<32x128xf32>, vector<8x128xf32> -> vector<8x128xf32>
    %90 = arith.addf %87, %89 : vector<8x128xf32>
    %91 = arith.negf %90 : vector<8x128xf32>
    %92 = math.exp %91 : vector<8x128xf32>
    %cst_35 = arith.constant 1.000000e+00 : f32
    %93 = vector.broadcast %cst_35 : f32 to vector<8x128xf32>
    %94 = arith.addf %93, %92 : vector<8x128xf32>
    %95 = arith.divf %93, %94 : vector<8x128xf32>
    %96 = math.tanh %90 : vector<8x128xf32>
    %97 = vector.extract_strided_slice %95 {offsets = [0, 0], sizes = [8, 32], strides = [1, 1]} : vector<8x128xf32> to vector<8x32xf32>
    %98 = vector.extract_strided_slice %95 {offsets = [0, 32], sizes = [8, 32], strides = [1, 1]} : vector<8x128xf32> to vector<8x32xf32>
    %99 = vector.extract_strided_slice %96 {offsets = [0, 64], sizes = [8, 32], strides = [1, 1]} : vector<8x128xf32> to vector<8x32xf32>
    %100 = vector.extract_strided_slice %95 {offsets = [0, 96], sizes = [8, 32], strides = [1, 1]} : vector<8x128xf32> to vector<8x32xf32>
    %101 = arith.mulf %98, %81 : vector<8x32xf32>
    %102 = arith.mulf %97, %99 : vector<8x32xf32>
    %103 = arith.addf %101, %102 : vector<8x32xf32>
    %104 = math.tanh %103 : vector<8x32xf32>
    %105 = arith.mulf %100, %104 : vector<8x32xf32>
    %c4_i32 = arith.constant 4 : i32
    %c8_i32_36 = arith.constant 8 : i32
    %106 = arith.muli %c4_i32, %c8_i32_36 : i32
    %107 = tpu.assume_multiple %106, 8 : i32
    %108 = arith.index_cast %107 : i32 to index
    %c0_37 = arith.constant 0 : index
    %109 = vector.load %arg17[%108, %c0_37] : memref<64x128xf32, #tpu.memory_space<vmem>>, vector<8x128xf32>
    %c0_38 = arith.constant 0 : index
    %c0_39 = arith.constant 0 : index
    %110 = vector.load %arg5[%c0_38, %c0_39] : memref<32x128xf32, #tpu.memory_space<vmem>>, vector<32x128xf32>
    %cst_40 = arith.constant dense<0.000000e+00> : vector<8x128xf32>
    %111 = tpu.matmul %105, %110, %cst_40 {dimension_numbers = #tpu.dot_dimension_numbers<[1], [0], [0], [1], [0, 0, 1, 1], [], []>} : vector<8x32xf32>, vector<32x128xf32>, vector<8x128xf32> -> vector<8x128xf32>
    %112 = arith.addf %109, %111 : vector<8x128xf32>
    %113 = arith.negf %112 : vector<8x128xf32>
    %114 = math.exp %113 : vector<8x128xf32>
    %cst_41 = arith.constant 1.000000e+00 : f32
    %115 = vector.broadcast %cst_41 : f32 to vector<8x128xf32>
    %116 = arith.addf %115, %114 : vector<8x128xf32>
    %117 = arith.divf %115, %116 : vector<8x128xf32>
    %118 = math.tanh %112 : vector<8x128xf32>
    %119 = vector.extract_strided_slice %117 {offsets = [0, 0], sizes = [8, 32], strides = [1, 1]} : vector<8x128xf32> to vector<8x32xf32>
    %120 = vector.extract_strided_slice %117 {offsets = [0, 32], sizes = [8, 32], strides = [1, 1]} : vector<8x128xf32> to vector<8x32xf32>
    %121 = vector.extract_strided_slice %118 {offsets = [0, 64], sizes = [8, 32], strides = [1, 1]} : vector<8x128xf32> to vector<8x32xf32>
    %122 = vector.extract_strided_slice %117 {offsets = [0, 96], sizes = [8, 32], strides = [1, 1]} : vector<8x128xf32> to vector<8x32xf32>
    %123 = arith.mulf %120, %103 : vector<8x32xf32>
    %124 = arith.mulf %119, %121 : vector<8x32xf32>
    %125 = arith.addf %123, %124 : vector<8x32xf32>
    %126 = math.tanh %125 : vector<8x32xf32>
    %127 = arith.mulf %122, %126 : vector<8x32xf32>
    %c5_i32 = arith.constant 5 : i32
    %c8_i32_42 = arith.constant 8 : i32
    %128 = arith.muli %c5_i32, %c8_i32_42 : i32
    %129 = tpu.assume_multiple %128, 8 : i32
    %130 = arith.index_cast %129 : i32 to index
    %c0_43 = arith.constant 0 : index
    %131 = vector.load %arg17[%130, %c0_43] : memref<64x128xf32, #tpu.memory_space<vmem>>, vector<8x128xf32>
    %c0_44 = arith.constant 0 : index
    %c0_45 = arith.constant 0 : index
    %132 = vector.load %arg5[%c0_44, %c0_45] : memref<32x128xf32, #tpu.memory_space<vmem>>, vector<32x128xf32>
    %cst_46 = arith.constant dense<0.000000e+00> : vector<8x128xf32>
    %133 = tpu.matmul %127, %132, %cst_46 {dimension_numbers = #tpu.dot_dimension_numbers<[1], [0], [0], [1], [0, 0, 1, 1], [], []>} : vector<8x32xf32>, vector<32x128xf32>, vector<8x128xf32> -> vector<8x128xf32>
    %134 = arith.addf %131, %133 : vector<8x128xf32>
    %135 = arith.negf %134 : vector<8x128xf32>
    %136 = math.exp %135 : vector<8x128xf32>
    %cst_47 = arith.constant 1.000000e+00 : f32
    %137 = vector.broadcast %cst_47 : f32 to vector<8x128xf32>
    %138 = arith.addf %137, %136 : vector<8x128xf32>
    %139 = arith.divf %137, %138 : vector<8x128xf32>
    %140 = math.tanh %134 : vector<8x128xf32>
    %141 = vector.extract_strided_slice %139 {offsets = [0, 0], sizes = [8, 32], strides = [1, 1]} : vector<8x128xf32> to vector<8x32xf32>
    %142 = vector.extract_strided_slice %139 {offsets = [0, 32], sizes = [8, 32], strides = [1, 1]} : vector<8x128xf32> to vector<8x32xf32>
    %143 = vector.extract_strided_slice %140 {offsets = [0, 64], sizes = [8, 32], strides = [1, 1]} : vector<8x128xf32> to vector<8x32xf32>
    %144 = vector.extract_strided_slice %139 {offsets = [0, 96], sizes = [8, 32], strides = [1, 1]} : vector<8x128xf32> to vector<8x32xf32>
    %145 = arith.mulf %142, %125 : vector<8x32xf32>
    %146 = arith.mulf %141, %143 : vector<8x32xf32>
    %147 = arith.addf %145, %146 : vector<8x32xf32>
    %148 = math.tanh %147 : vector<8x32xf32>
    %149 = arith.mulf %144, %148 : vector<8x32xf32>
    %c6_i32 = arith.constant 6 : i32
    %c8_i32_48 = arith.constant 8 : i32
    %150 = arith.muli %c6_i32, %c8_i32_48 : i32
    %151 = tpu.assume_multiple %150, 8 : i32
    %152 = arith.index_cast %151 : i32 to index
    %c0_49 = arith.constant 0 : index
    %153 = vector.load %arg17[%152, %c0_49] : memref<64x128xf32, #tpu.memory_space<vmem>>, vector<8x128xf32>
    %c0_50 = arith.constant 0 : index
    %c0_51 = arith.constant 0 : index
    %154 = vector.load %arg5[%c0_50, %c0_51] : memref<32x128xf32, #tpu.memory_space<vmem>>, vector<32x128xf32>
    %cst_52 = arith.constant dense<0.000000e+00> : vector<8x128xf32>
    %155 = tpu.matmul %149, %154, %cst_52 {dimension_numbers = #tpu.dot_dimension_numbers<[1], [0], [0], [1], [0, 0, 1, 1], [], []>} : vector<8x32xf32>, vector<32x128xf32>, vector<8x128xf32> -> vector<8x128xf32>
    %156 = arith.addf %153, %155 : vector<8x128xf32>
    %157 = arith.negf %156 : vector<8x128xf32>
    %158 = math.exp %157 : vector<8x128xf32>
    %cst_53 = arith.constant 1.000000e+00 : f32
    %159 = vector.broadcast %cst_53 : f32 to vector<8x128xf32>
    %160 = arith.addf %159, %158 : vector<8x128xf32>
    %161 = arith.divf %159, %160 : vector<8x128xf32>
    %162 = math.tanh %156 : vector<8x128xf32>
    %163 = vector.extract_strided_slice %161 {offsets = [0, 0], sizes = [8, 32], strides = [1, 1]} : vector<8x128xf32> to vector<8x32xf32>
    %164 = vector.extract_strided_slice %161 {offsets = [0, 32], sizes = [8, 32], strides = [1, 1]} : vector<8x128xf32> to vector<8x32xf32>
    %165 = vector.extract_strided_slice %162 {offsets = [0, 64], sizes = [8, 32], strides = [1, 1]} : vector<8x128xf32> to vector<8x32xf32>
    %166 = vector.extract_strided_slice %161 {offsets = [0, 96], sizes = [8, 32], strides = [1, 1]} : vector<8x128xf32> to vector<8x32xf32>
    %167 = arith.mulf %164, %147 : vector<8x32xf32>
    %168 = arith.mulf %163, %165 : vector<8x32xf32>
    %169 = arith.addf %167, %168 : vector<8x32xf32>
    %170 = math.tanh %169 : vector<8x32xf32>
    %171 = arith.mulf %166, %170 : vector<8x32xf32>
    %c7_i32 = arith.constant 7 : i32
    %c8_i32_54 = arith.constant 8 : i32
    %172 = arith.muli %c7_i32, %c8_i32_54 : i32
    %173 = tpu.assume_multiple %172, 8 : i32
    %174 = arith.index_cast %173 : i32 to index
    %c0_55 = arith.constant 0 : index
    %175 = vector.load %arg17[%174, %c0_55] : memref<64x128xf32, #tpu.memory_space<vmem>>, vector<8x128xf32>
    %c0_56 = arith.constant 0 : index
    %c0_57 = arith.constant 0 : index
    %176 = vector.load %arg5[%c0_56, %c0_57] : memref<32x128xf32, #tpu.memory_space<vmem>>, vector<32x128xf32>
    %cst_58 = arith.constant dense<0.000000e+00> : vector<8x128xf32>
    %177 = tpu.matmul %171, %176, %cst_58 {dimension_numbers = #tpu.dot_dimension_numbers<[1], [0], [0], [1], [0, 0, 1, 1], [], []>} : vector<8x32xf32>, vector<32x128xf32>, vector<8x128xf32> -> vector<8x128xf32>
    %178 = arith.addf %175, %177 : vector<8x128xf32>
    %179 = arith.negf %178 : vector<8x128xf32>
    %180 = math.exp %179 : vector<8x128xf32>
    %cst_59 = arith.constant 1.000000e+00 : f32
    %181 = vector.broadcast %cst_59 : f32 to vector<8x128xf32>
    %182 = arith.addf %181, %180 : vector<8x128xf32>
    %183 = arith.divf %181, %182 : vector<8x128xf32>
    %184 = math.tanh %178 : vector<8x128xf32>
    %185 = vector.extract_strided_slice %183 {offsets = [0, 0], sizes = [8, 32], strides = [1, 1]} : vector<8x128xf32> to vector<8x32xf32>
    %186 = vector.extract_strided_slice %183 {offsets = [0, 32], sizes = [8, 32], strides = [1, 1]} : vector<8x128xf32> to vector<8x32xf32>
    %187 = vector.extract_strided_slice %184 {offsets = [0, 64], sizes = [8, 32], strides = [1, 1]} : vector<8x128xf32> to vector<8x32xf32>
    %188 = vector.extract_strided_slice %183 {offsets = [0, 96], sizes = [8, 32], strides = [1, 1]} : vector<8x128xf32> to vector<8x32xf32>
    %189 = arith.mulf %186, %169 : vector<8x32xf32>
    %190 = arith.mulf %185, %187 : vector<8x32xf32>
    %191 = arith.addf %189, %190 : vector<8x32xf32>
    %192 = math.tanh %191 : vector<8x32xf32>
    %193 = arith.mulf %188, %192 : vector<8x32xf32>
    %c8_i32_60 = arith.constant 8 : i32
    %c0_61 = arith.constant 0 : index
    %c0_62 = arith.constant 0 : index
    %194 = vector.load %arg7[%c0_61, %c0_62] : memref<32x128xf32, #tpu.memory_space<vmem>>, vector<32x128xf32>
    %cst_63 = arith.constant dense<0.000000e+00> : vector<8x128xf32>
    %195 = tpu.matmul %193, %194, %cst_63 {dimension_numbers = #tpu.dot_dimension_numbers<[1], [0], [0], [1], [0, 0, 1, 1], [], []>} : vector<8x32xf32>, vector<32x128xf32>, vector<8x128xf32> -> vector<8x128xf32>
    %c0_64 = arith.constant 0 : index
    %c0_65 = arith.constant 0 : index
    %196 = vector.load %arg8[%c0_64, %c0_65] : memref<1x128xf32, #tpu.memory_space<vmem>>, vector<1x128xf32>
    %197 = vector.broadcast %196 : vector<1x128xf32> to vector<8x128xf32>
    %198 = arith.addf %195, %197 : vector<8x128xf32>
    %c0_66 = arith.constant 0 : index
    %c0_67 = arith.constant 0 : index
    %199 = vector.load %arg15[%c0_66, %c0_67] : memref<8x128xf32, #tpu.memory_space<vmem>>, vector<8x128xf32>
    tpu.vector_store %arg15[%c0_66, %c0_67], %198 {strides = array<i32>} : memref<8x128xf32, #tpu.memory_space<vmem>>, vector<8x128xf32>,
    %200 = vector.extract_strided_slice %198 {offsets = [0, 0], sizes = [8, 40], strides = [1, 1]} : vector<8x128xf32> to vector<8x40xf32>
    %201 = vector.extract_strided_slice %198 {offsets = [0, 40], sizes = [8, 40], strides = [1, 1]} : vector<8x128xf32> to vector<8x40xf32>
    %c0_68 = arith.constant 0 : index
    %c0_69 = arith.constant 0 : index
    %202 = vector.load %arg9[%c0_68, %c0_69] : memref<8x40xf32, #tpu.memory_space<vmem>>, vector<8x40xf32>
    %cst_70 = arith.constant 5.000000e-01 : f32
    %203 = vector.broadcast %cst_70 : f32 to vector<8x40xf32>
    %204 = arith.mulf %203, %201 : vector<8x40xf32>
    %205 = math.exp %204 : vector<8x40xf32>
    %206 = arith.mulf %202, %205 : vector<8x40xf32>
    %207 = arith.addf %206, %200 : vector<8x40xf32>
    %c0_71 = arith.constant 0 : index
    %c0_72 = arith.constant 0 : index
    %208 = vector.load %arg16[%c0_71, %c0_72] : memref<8x40xf32, #tpu.memory_space<vmem>>, vector<8x40xf32>
    tpu.vector_store %arg16[%c0_71, %c0_72], %207 {strides = array<i32>} : memref<8x40xf32, #tpu.memory_space<vmem>>, vector<8x40xf32>,
    %c0_73 = arith.constant 0 : index
    %c0_74 = arith.constant 0 : index
    %209 = vector.load %arg10[%c0_73, %c0_74] : memref<40x32xf32, #tpu.memory_space<vmem>>, vector<40x32xf32>
    %cst_75 = arith.constant dense<0.000000e+00> : vector<8x32xf32>
    %210 = tpu.matmul %207, %209, %cst_75 {dimension_numbers = #tpu.dot_dimension_numbers<[1], [0], [0], [1], [0, 0, 1, 1], [], []>} : vector<8x40xf32>, vector<40x32xf32>, vector<8x32xf32> -> vector<8x32xf32>
    %c0_76 = arith.constant 0 : index
    %c0_77 = arith.constant 0 : index
    %211 = vector.load %arg11[%c0_76, %c0_77] : memref<1x32xf32, #tpu.memory_space<vmem>>, vector<1x32xf32>
    %212 = vector.broadcast %211 : vector<1x32xf32> to vector<8x32xf32>
    %213 = arith.addf %210, %212 : vector<8x32xf32>
    %c0_i32_78 = arith.constant 0 : i32
    %c8_i32_79 = arith.constant 8 : i32
    %214 = arith.muli %c0_i32_78, %c8_i32_79 : i32
    %215 = tpu.assume_multiple %214, 8 : i32
    %216 = arith.index_cast %215 : i32 to index
    %c0_80 = arith.constant 0 : index
    %217 = vector.load %arg18[%216, %c0_80] : memref<64x128xf32, #tpu.memory_space<vmem>>, vector<8x128xf32>
    %c0_81 = arith.constant 0 : index
    %c0_82 = arith.constant 0 : index
    %218 = vector.load %arg6[%c0_81, %c0_82] : memref<32x128xf32, #tpu.memory_space<vmem>>, vector<32x128xf32>
    %cst_83 = arith.constant dense<0.000000e+00> : vector<8x128xf32>
    %219 = tpu.matmul %213, %218, %cst_83 {dimension_numbers = #tpu.dot_dimension_numbers<[1], [0], [0], [1], [0, 0, 1, 1], [], []>} : vector<8x32xf32>, vector<32x128xf32>, vector<8x128xf32> -> vector<8x128xf32>
    %220 = arith.addf %217, %219 : vector<8x128xf32>
    %221 = arith.negf %220 : vector<8x128xf32>
    %222 = math.exp %221 : vector<8x128xf32>
    %cst_84 = arith.constant 1.000000e+00 : f32
    %223 = vector.broadcast %cst_84 : f32 to vector<8x128xf32>
    %224 = arith.addf %223, %222 : vector<8x128xf32>
    %225 = arith.divf %223, %224 : vector<8x128xf32>
    %226 = math.tanh %220 : vector<8x128xf32>
    %227 = vector.extract_strided_slice %225 {offsets = [0, 0], sizes = [8, 32], strides = [1, 1]} : vector<8x128xf32> to vector<8x32xf32>
    %228 = vector.extract_strided_slice %225 {offsets = [0, 32], sizes = [8, 32], strides = [1, 1]} : vector<8x128xf32> to vector<8x32xf32>
    %229 = vector.extract_strided_slice %226 {offsets = [0, 64], sizes = [8, 32], strides = [1, 1]} : vector<8x128xf32> to vector<8x32xf32>
    %230 = vector.extract_strided_slice %225 {offsets = [0, 96], sizes = [8, 32], strides = [1, 1]} : vector<8x128xf32> to vector<8x32xf32>
    %231 = arith.mulf %228, %17 : vector<8x32xf32>
    %232 = arith.mulf %227, %229 : vector<8x32xf32>
    %233 = arith.addf %231, %232 : vector<8x32xf32>
    %234 = math.tanh %233 : vector<8x32xf32>
    %235 = arith.mulf %230, %234 : vector<8x32xf32>
    %236 = arith.index_cast %215 : i32 to index
    %c0_85 = arith.constant 0 : index
    %237 = vector.load %arg19[%236, %c0_85] : memref<64x32xf32, #tpu.memory_space<vmem>>, vector<8x32xf32>
    tpu.vector_store %arg19[%236, %c0_85], %235 {strides = array<i32>} : memref<64x32xf32, #tpu.memory_space<vmem>>, vector<8x32xf32>,
    %c1_i32_86 = arith.constant 1 : i32
    %c8_i32_87 = arith.constant 8 : i32
    %238 = arith.muli %c1_i32_86, %c8_i32_87 : i32
    %239 = tpu.assume_multiple %238, 8 : i32
    %240 = arith.index_cast %239 : i32 to index
    %c0_88 = arith.constant 0 : index
    %241 = vector.load %arg18[%240, %c0_88] : memref<64x128xf32, #tpu.memory_space<vmem>>, vector<8x128xf32>
    %c0_89 = arith.constant 0 : index
    %c0_90 = arith.constant 0 : index
    %242 = vector.load %arg6[%c0_89, %c0_90] : memref<32x128xf32, #tpu.memory_space<vmem>>, vector<32x128xf32>
    %cst_91 = arith.constant dense<0.000000e+00> : vector<8x128xf32>
    %243 = tpu.matmul %235, %242, %cst_91 {dimension_numbers = #tpu.dot_dimension_numbers<[1], [0], [0], [1], [0, 0, 1, 1], [], []>} : vector<8x32xf32>, vector<32x128xf32>, vector<8x128xf32> -> vector<8x128xf32>
    %244 = arith.addf %241, %243 : vector<8x128xf32>
    %245 = arith.negf %244 : vector<8x128xf32>
    %246 = math.exp %245 : vector<8x128xf32>
    %cst_92 = arith.constant 1.000000e+00 : f32
    %247 = vector.broadcast %cst_92 : f32 to vector<8x128xf32>
    %248 = arith.addf %247, %246 : vector<8x128xf32>
    %249 = arith.divf %247, %248 : vector<8x128xf32>
    %250 = math.tanh %244 : vector<8x128xf32>
    %251 = vector.extract_strided_slice %249 {offsets = [0, 0], sizes = [8, 32], strides = [1, 1]} : vector<8x128xf32> to vector<8x32xf32>
    %252 = vector.extract_strided_slice %249 {offsets = [0, 32], sizes = [8, 32], strides = [1, 1]} : vector<8x128xf32> to vector<8x32xf32>
    %253 = vector.extract_strided_slice %250 {offsets = [0, 64], sizes = [8, 32], strides = [1, 1]} : vector<8x128xf32> to vector<8x32xf32>
    %254 = vector.extract_strided_slice %249 {offsets = [0, 96], sizes = [8, 32], strides = [1, 1]} : vector<8x128xf32> to vector<8x32xf32>
    %255 = arith.mulf %252, %233 : vector<8x32xf32>
    %256 = arith.mulf %251, %253 : vector<8x32xf32>
    %257 = arith.addf %255, %256 : vector<8x32xf32>
    %258 = math.tanh %257 : vector<8x32xf32>
    %259 = arith.mulf %254, %258 : vector<8x32xf32>
    %260 = arith.index_cast %239 : i32 to index
    %c0_93 = arith.constant 0 : index
    %261 = vector.load %arg19[%260, %c0_93] : memref<64x32xf32, #tpu.memory_space<vmem>>, vector<8x32xf32>
    tpu.vector_store %arg19[%260, %c0_93], %259 {strides = array<i32>} : memref<64x32xf32, #tpu.memory_space<vmem>>, vector<8x32xf32>,
    %c2_i32_94 = arith.constant 2 : i32
    %c8_i32_95 = arith.constant 8 : i32
    %262 = arith.muli %c2_i32_94, %c8_i32_95 : i32
    %263 = tpu.assume_multiple %262, 8 : i32
    %264 = arith.index_cast %263 : i32 to index
    %c0_96 = arith.constant 0 : index
    %265 = vector.load %arg18[%264, %c0_96] : memref<64x128xf32, #tpu.memory_space<vmem>>, vector<8x128xf32>
    %c0_97 = arith.constant 0 : index
    %c0_98 = arith.constant 0 : index
    %266 = vector.load %arg6[%c0_97, %c0_98] : memref<32x128xf32, #tpu.memory_space<vmem>>, vector<32x128xf32>
    %cst_99 = arith.constant dense<0.000000e+00> : vector<8x128xf32>
    %267 = tpu.matmul %259, %266, %cst_99 {dimension_numbers = #tpu.dot_dimension_numbers<[1], [0], [0], [1], [0, 0, 1, 1], [], []>} : vector<8x32xf32>, vector<32x128xf32>, vector<8x128xf32> -> vector<8x128xf32>
    %268 = arith.addf %265, %267 : vector<8x128xf32>
    %269 = arith.negf %268 : vector<8x128xf32>
    %270 = math.exp %269 : vector<8x128xf32>
    %cst_100 = arith.constant 1.000000e+00 : f32
    %271 = vector.broadcast %cst_100 : f32 to vector<8x128xf32>
    %272 = arith.addf %271, %270 : vector<8x128xf32>
    %273 = arith.divf %271, %272 : vector<8x128xf32>
    %274 = math.tanh %268 : vector<8x128xf32>
    %275 = vector.extract_strided_slice %273 {offsets = [0, 0], sizes = [8, 32], strides = [1, 1]} : vector<8x128xf32> to vector<8x32xf32>
    %276 = vector.extract_strided_slice %273 {offsets = [0, 32], sizes = [8, 32], strides = [1, 1]} : vector<8x128xf32> to vector<8x32xf32>
    %277 = vector.extract_strided_slice %274 {offsets = [0, 64], sizes = [8, 32], strides = [1, 1]} : vector<8x128xf32> to vector<8x32xf32>
    %278 = vector.extract_strided_slice %273 {offsets = [0, 96], sizes = [8, 32], strides = [1, 1]} : vector<8x128xf32> to vector<8x32xf32>
    %279 = arith.mulf %276, %257 : vector<8x32xf32>
    %280 = arith.mulf %275, %277 : vector<8x32xf32>
    %281 = arith.addf %279, %280 : vector<8x32xf32>
    %282 = math.tanh %281 : vector<8x32xf32>
    %283 = arith.mulf %278, %282 : vector<8x32xf32>
    %284 = arith.index_cast %263 : i32 to index
    %c0_101 = arith.constant 0 : index
    %285 = vector.load %arg19[%284, %c0_101] : memref<64x32xf32, #tpu.memory_space<vmem>>, vector<8x32xf32>
    tpu.vector_store %arg19[%284, %c0_101], %283 {strides = array<i32>} : memref<64x32xf32, #tpu.memory_space<vmem>>, vector<8x32xf32>,
    %c3_i32_102 = arith.constant 3 : i32
    %c8_i32_103 = arith.constant 8 : i32
    %286 = arith.muli %c3_i32_102, %c8_i32_103 : i32
    %287 = tpu.assume_multiple %286, 8 : i32
    %288 = arith.index_cast %287 : i32 to index
    %c0_104 = arith.constant 0 : index
    %289 = vector.load %arg18[%288, %c0_104] : memref<64x128xf32, #tpu.memory_space<vmem>>, vector<8x128xf32>
    %c0_105 = arith.constant 0 : index
    %c0_106 = arith.constant 0 : index
    %290 = vector.load %arg6[%c0_105, %c0_106] : memref<32x128xf32, #tpu.memory_space<vmem>>, vector<32x128xf32>
    %cst_107 = arith.constant dense<0.000000e+00> : vector<8x128xf32>
    %291 = tpu.matmul %283, %290, %cst_107 {dimension_numbers = #tpu.dot_dimension_numbers<[1], [0], [0], [1], [0, 0, 1, 1], [], []>} : vector<8x32xf32>, vector<32x128xf32>, vector<8x128xf32> -> vector<8x128xf32>
    %292 = arith.addf %289, %291 : vector<8x128xf32>
    %293 = arith.negf %292 : vector<8x128xf32>
    %294 = math.exp %293 : vector<8x128xf32>
    %cst_108 = arith.constant 1.000000e+00 : f32
    %295 = vector.broadcast %cst_108 : f32 to vector<8x128xf32>
    %296 = arith.addf %295, %294 : vector<8x128xf32>
    %297 = arith.divf %295, %296 : vector<8x128xf32>
    %298 = math.tanh %292 : vector<8x128xf32>
    %299 = vector.extract_strided_slice %297 {offsets = [0, 0], sizes = [8, 32], strides = [1, 1]} : vector<8x128xf32> to vector<8x32xf32>
    %300 = vector.extract_strided_slice %297 {offsets = [0, 32], sizes = [8, 32], strides = [1, 1]} : vector<8x128xf32> to vector<8x32xf32>
    %301 = vector.extract_strided_slice %298 {offsets = [0, 64], sizes = [8, 32], strides = [1, 1]} : vector<8x128xf32> to vector<8x32xf32>
    %302 = vector.extract_strided_slice %297 {offsets = [0, 96], sizes = [8, 32], strides = [1, 1]} : vector<8x128xf32> to vector<8x32xf32>
    %303 = arith.mulf %300, %281 : vector<8x32xf32>
    %304 = arith.mulf %299, %301 : vector<8x32xf32>
    %305 = arith.addf %303, %304 : vector<8x32xf32>
    %306 = math.tanh %305 : vector<8x32xf32>
    %307 = arith.mulf %302, %306 : vector<8x32xf32>
    %308 = arith.index_cast %287 : i32 to index
    %c0_109 = arith.constant 0 : index
    %309 = vector.load %arg19[%308, %c0_109] : memref<64x32xf32, #tpu.memory_space<vmem>>, vector<8x32xf32>
    tpu.vector_store %arg19[%308, %c0_109], %307 {strides = array<i32>} : memref<64x32xf32, #tpu.memory_space<vmem>>, vector<8x32xf32>,
    %c4_i32_110 = arith.constant 4 : i32
    %c8_i32_111 = arith.constant 8 : i32
    %310 = arith.muli %c4_i32_110, %c8_i32_111 : i32
    %311 = tpu.assume_multiple %310, 8 : i32
    %312 = arith.index_cast %311 : i32 to index
    %c0_112 = arith.constant 0 : index
    %313 = vector.load %arg18[%312, %c0_112] : memref<64x128xf32, #tpu.memory_space<vmem>>, vector<8x128xf32>
    %c0_113 = arith.constant 0 : index
    %c0_114 = arith.constant 0 : index
    %314 = vector.load %arg6[%c0_113, %c0_114] : memref<32x128xf32, #tpu.memory_space<vmem>>, vector<32x128xf32>
    %cst_115 = arith.constant dense<0.000000e+00> : vector<8x128xf32>
    %315 = tpu.matmul %307, %314, %cst_115 {dimension_numbers = #tpu.dot_dimension_numbers<[1], [0], [0], [1], [0, 0, 1, 1], [], []>} : vector<8x32xf32>, vector<32x128xf32>, vector<8x128xf32> -> vector<8x128xf32>
    %316 = arith.addf %313, %315 : vector<8x128xf32>
    %317 = arith.negf %316 : vector<8x128xf32>
    %318 = math.exp %317 : vector<8x128xf32>
    %cst_116 = arith.constant 1.000000e+00 : f32
    %319 = vector.broadcast %cst_116 : f32 to vector<8x128xf32>
    %320 = arith.addf %319, %318 : vector<8x128xf32>
    %321 = arith.divf %319, %320 : vector<8x128xf32>
    %322 = math.tanh %316 : vector<8x128xf32>
    %323 = vector.extract_strided_slice %321 {offsets = [0, 0], sizes = [8, 32], strides = [1, 1]} : vector<8x128xf32> to vector<8x32xf32>
    %324 = vector.extract_strided_slice %321 {offsets = [0, 32], sizes = [8, 32], strides = [1, 1]} : vector<8x128xf32> to vector<8x32xf32>
    %325 = vector.extract_strided_slice %322 {offsets = [0, 64], sizes = [8, 32], strides = [1, 1]} : vector<8x128xf32> to vector<8x32xf32>
    %326 = vector.extract_strided_slice %321 {offsets = [0, 96], sizes = [8, 32], strides = [1, 1]} : vector<8x128xf32> to vector<8x32xf32>
    %327 = arith.mulf %324, %305 : vector<8x32xf32>
    %328 = arith.mulf %323, %325 : vector<8x32xf32>
    %329 = arith.addf %327, %328 : vector<8x32xf32>
    %330 = math.tanh %329 : vector<8x32xf32>
    %331 = arith.mulf %326, %330 : vector<8x32xf32>
    %332 = arith.index_cast %311 : i32 to index
    %c0_117 = arith.constant 0 : index
    %333 = vector.load %arg19[%332, %c0_117] : memref<64x32xf32, #tpu.memory_space<vmem>>, vector<8x32xf32>
    tpu.vector_store %arg19[%332, %c0_117], %331 {strides = array<i32>} : memref<64x32xf32, #tpu.memory_space<vmem>>, vector<8x32xf32>,
    %c5_i32_118 = arith.constant 5 : i32
    %c8_i32_119 = arith.constant 8 : i32
    %334 = arith.muli %c5_i32_118, %c8_i32_119 : i32
    %335 = tpu.assume_multiple %334, 8 : i32
    %336 = arith.index_cast %335 : i32 to index
    %c0_120 = arith.constant 0 : index
    %337 = vector.load %arg18[%336, %c0_120] : memref<64x128xf32, #tpu.memory_space<vmem>>, vector<8x128xf32>
    %c0_121 = arith.constant 0 : index
    %c0_122 = arith.constant 0 : index
    %338 = vector.load %arg6[%c0_121, %c0_122] : memref<32x128xf32, #tpu.memory_space<vmem>>, vector<32x128xf32>
    %cst_123 = arith.constant dense<0.000000e+00> : vector<8x128xf32>
    %339 = tpu.matmul %331, %338, %cst_123 {dimension_numbers = #tpu.dot_dimension_numbers<[1], [0], [0], [1], [0, 0, 1, 1], [], []>} : vector<8x32xf32>, vector<32x128xf32>, vector<8x128xf32> -> vector<8x128xf32>
    %340 = arith.addf %337, %339 : vector<8x128xf32>
    %341 = arith.negf %340 : vector<8x128xf32>
    %342 = math.exp %341 : vector<8x128xf32>
    %cst_124 = arith.constant 1.000000e+00 : f32
    %343 = vector.broadcast %cst_124 : f32 to vector<8x128xf32>
    %344 = arith.addf %343, %342 : vector<8x128xf32>
    %345 = arith.divf %343, %344 : vector<8x128xf32>
    %346 = math.tanh %340 : vector<8x128xf32>
    %347 = vector.extract_strided_slice %345 {offsets = [0, 0], sizes = [8, 32], strides = [1, 1]} : vector<8x128xf32> to vector<8x32xf32>
    %348 = vector.extract_strided_slice %345 {offsets = [0, 32], sizes = [8, 32], strides = [1, 1]} : vector<8x128xf32> to vector<8x32xf32>
    %349 = vector.extract_strided_slice %346 {offsets = [0, 64], sizes = [8, 32], strides = [1, 1]} : vector<8x128xf32> to vector<8x32xf32>
    %350 = vector.extract_strided_slice %345 {offsets = [0, 96], sizes = [8, 32], strides = [1, 1]} : vector<8x128xf32> to vector<8x32xf32>
    %351 = arith.mulf %348, %329 : vector<8x32xf32>
    %352 = arith.mulf %347, %349 : vector<8x32xf32>
    %353 = arith.addf %351, %352 : vector<8x32xf32>
    %354 = math.tanh %353 : vector<8x32xf32>
    %355 = arith.mulf %350, %354 : vector<8x32xf32>
    %356 = arith.index_cast %335 : i32 to index
    %c0_125 = arith.constant 0 : index
    %357 = vector.load %arg19[%356, %c0_125] : memref<64x32xf32, #tpu.memory_space<vmem>>, vector<8x32xf32>
    tpu.vector_store %arg19[%356, %c0_125], %355 {strides = array<i32>} : memref<64x32xf32, #tpu.memory_space<vmem>>, vector<8x32xf32>,
    %c6_i32_126 = arith.constant 6 : i32
    %c8_i32_127 = arith.constant 8 : i32
    %358 = arith.muli %c6_i32_126, %c8_i32_127 : i32
    %359 = tpu.assume_multiple %358, 8 : i32
    %360 = arith.index_cast %359 : i32 to index
    %c0_128 = arith.constant 0 : index
    %361 = vector.load %arg18[%360, %c0_128] : memref<64x128xf32, #tpu.memory_space<vmem>>, vector<8x128xf32>
    %c0_129 = arith.constant 0 : index
    %c0_130 = arith.constant 0 : index
    %362 = vector.load %arg6[%c0_129, %c0_130] : memref<32x128xf32, #tpu.memory_space<vmem>>, vector<32x128xf32>
    %cst_131 = arith.constant dense<0.000000e+00> : vector<8x128xf32>
    %363 = tpu.matmul %355, %362, %cst_131 {dimension_numbers = #tpu.dot_dimension_numbers<[1], [0], [0], [1], [0, 0, 1, 1], [], []>} : vector<8x32xf32>, vector<32x128xf32>, vector<8x128xf32> -> vector<8x128xf32>
    %364 = arith.addf %361, %363 : vector<8x128xf32>
    %365 = arith.negf %364 : vector<8x128xf32>
    %366 = math.exp %365 : vector<8x128xf32>
    %cst_132 = arith.constant 1.000000e+00 : f32
    %367 = vector.broadcast %cst_132 : f32 to vector<8x128xf32>
    %368 = arith.addf %367, %366 : vector<8x128xf32>
    %369 = arith.divf %367, %368 : vector<8x128xf32>
    %370 = math.tanh %364 : vector<8x128xf32>
    %371 = vector.extract_strided_slice %369 {offsets = [0, 0], sizes = [8, 32], strides = [1, 1]} : vector<8x128xf32> to vector<8x32xf32>
    %372 = vector.extract_strided_slice %369 {offsets = [0, 32], sizes = [8, 32], strides = [1, 1]} : vector<8x128xf32> to vector<8x32xf32>
    %373 = vector.extract_strided_slice %370 {offsets = [0, 64], sizes = [8, 32], strides = [1, 1]} : vector<8x128xf32> to vector<8x32xf32>
    %374 = vector.extract_strided_slice %369 {offsets = [0, 96], sizes = [8, 32], strides = [1, 1]} : vector<8x128xf32> to vector<8x32xf32>
    %375 = arith.mulf %372, %353 : vector<8x32xf32>
    %376 = arith.mulf %371, %373 : vector<8x32xf32>
    %377 = arith.addf %375, %376 : vector<8x32xf32>
    %378 = math.tanh %377 : vector<8x32xf32>
    %379 = arith.mulf %374, %378 : vector<8x32xf32>
    %380 = arith.index_cast %359 : i32 to index
    %c0_133 = arith.constant 0 : index
    %381 = vector.load %arg19[%380, %c0_133] : memref<64x32xf32, #tpu.memory_space<vmem>>, vector<8x32xf32>
    tpu.vector_store %arg19[%380, %c0_133], %379 {strides = array<i32>} : memref<64x32xf32, #tpu.memory_space<vmem>>, vector<8x32xf32>,
    %c7_i32_134 = arith.constant 7 : i32
    %c8_i32_135 = arith.constant 8 : i32
    %382 = arith.muli %c7_i32_134, %c8_i32_135 : i32
    %383 = tpu.assume_multiple %382, 8 : i32
    %384 = arith.index_cast %383 : i32 to index
    %c0_136 = arith.constant 0 : index
    %385 = vector.load %arg18[%384, %c0_136] : memref<64x128xf32, #tpu.memory_space<vmem>>, vector<8x128xf32>
    %c0_137 = arith.constant 0 : index
    %c0_138 = arith.constant 0 : index
    %386 = vector.load %arg6[%c0_137, %c0_138] : memref<32x128xf32, #tpu.memory_space<vmem>>, vector<32x128xf32>
    %cst_139 = arith.constant dense<0.000000e+00> : vector<8x128xf32>
    %387 = tpu.matmul %379, %386, %cst_139 {dimension_numbers = #tpu.dot_dimension_numbers<[1], [0], [0], [1], [0, 0, 1, 1], [], []>} : vector<8x32xf32>, vector<32x128xf32>, vector<8x128xf32> -> vector<8x128xf32>
    %388 = arith.addf %385, %387 : vector<8x128xf32>
    %389 = arith.negf %388 : vector<8x128xf32>
    %390 = math.exp %389 : vector<8x128xf32>
    %cst_140 = arith.constant 1.000000e+00 : f32
    %391 = vector.broadcast %cst_140 : f32 to vector<8x128xf32>
    %392 = arith.addf %391, %390 : vector<8x128xf32>
    %393 = arith.divf %391, %392 : vector<8x128xf32>
    %394 = math.tanh %388 : vector<8x128xf32>
    %395 = vector.extract_strided_slice %393 {offsets = [0, 0], sizes = [8, 32], strides = [1, 1]} : vector<8x128xf32> to vector<8x32xf32>
    %396 = vector.extract_strided_slice %393 {offsets = [0, 32], sizes = [8, 32], strides = [1, 1]} : vector<8x128xf32> to vector<8x32xf32>
    %397 = vector.extract_strided_slice %394 {offsets = [0, 64], sizes = [8, 32], strides = [1, 1]} : vector<8x128xf32> to vector<8x32xf32>
    %398 = vector.extract_strided_slice %393 {offsets = [0, 96], sizes = [8, 32], strides = [1, 1]} : vector<8x128xf32> to vector<8x32xf32>
    %399 = arith.mulf %396, %377 : vector<8x32xf32>
    %400 = arith.mulf %395, %397 : vector<8x32xf32>
    %401 = arith.addf %399, %400 : vector<8x32xf32>
    %402 = math.tanh %401 : vector<8x32xf32>
    %403 = arith.mulf %398, %402 : vector<8x32xf32>
    %404 = arith.index_cast %383 : i32 to index
    %c0_141 = arith.constant 0 : index
    %405 = vector.load %arg19[%404, %c0_141] : memref<64x32xf32, #tpu.memory_space<vmem>>, vector<8x32xf32>
    tpu.vector_store %arg19[%404, %c0_141], %403 {strides = array<i32>} : memref<64x32xf32, #tpu.memory_space<vmem>>, vector<8x32xf32>,
    %c8_i32_142 = arith.constant 8 : i32
    %c0_143 = arith.constant 0 : index
    %c0_144 = arith.constant 0 : index
    %406 = vector.load %arg19[%c0_143, %c0_144] : memref<64x32xf32, #tpu.memory_space<vmem>>, vector<64x32xf32>
    %c0_145 = arith.constant 0 : index
    %c0_146 = arith.constant 0 : index
    %407 = vector.load %arg12[%c0_145, %c0_146] : memref<32x128xf32, #tpu.memory_space<vmem>>, vector<32x128xf32>
    %cst_147 = arith.constant dense<0.000000e+00> : vector<64x128xf32>
    %408 = tpu.matmul %406, %407, %cst_147 {dimension_numbers = #tpu.dot_dimension_numbers<[1], [0], [0], [1], [0, 0, 1, 1], [], []>} : vector<64x32xf32>, vector<32x128xf32>, vector<64x128xf32> -> vector<64x128xf32>
    %c0_148 = arith.constant 0 : index
    %c0_149 = arith.constant 0 : index
    %409 = vector.load %arg13[%c0_148, %c0_149] : memref<1x128xf32, #tpu.memory_space<vmem>>, vector<1x128xf32>
    %410 = vector.broadcast %409 : vector<1x128xf32> to vector<64x128xf32>
    %411 = arith.addf %408, %410 : vector<64x128xf32>
    %cst_150 = arith.constant dense<0xFF800000> : vector<64xf32>
    %412 = vector.multi_reduction <maximumf>, %411, %cst_150 [1] : vector<64x128xf32> to vector<64xf32>
    %413 = vector.shape_cast %412 : vector<64xf32> to vector<64x1xf32>
    %414 = vector.broadcast %413 : vector<64x1xf32> to vector<64x128xf32>
    %415 = arith.subf %411, %414 : vector<64x128xf32>
    %416 = math.exp %415 : vector<64x128xf32>
    %cst_151 = arith.constant dense<0.000000e+00> : vector<64xf32>
    %417 = vector.multi_reduction <add>, %416, %cst_151 [1] : vector<64x128xf32> to vector<64xf32>
    %418 = vector.shape_cast %417 : vector<64xf32> to vector<64x1xf32>
    %419 = tpu.reciprocal %418 {approx = true} : vector<64x1xf32> -> vector<64x1xf32>
    %420 = vector.broadcast %419 : vector<64x1xf32> to vector<64x128xf32>
    %421 = arith.mulf %416, %420 : vector<64x128xf32>
    %c0_152 = arith.constant 0 : index
    %c0_153 = arith.constant 0 : index
    %422 = vector.load %arg14[%c0_152, %c0_153] : memref<64x128xf32, #tpu.memory_space<vmem>>, vector<64x128xf32>
    tpu.vector_store %arg14[%c0_152, %c0_153], %421 {strides = array<i32>} : memref<64x128xf32, #tpu.memory_space<vmem>>, vector<64x128xf32>,
    return
  }
  func.func @transform_0(%arg0: i32) -> (i32, i32) {
    %c0_i32 = arith.constant 0 : i32
    %c0_i32_0 = arith.constant 0 : i32
    %c0_i32_1 = arith.constant 0 : i32
    return %c0_i32, %c0_i32_0 : i32, i32
  }
  func.func @transform_1(%arg0: i32) -> (i32, i32) {
    %c0_i32 = arith.constant 0 : i32
    %c0_i32_0 = arith.constant 0 : i32
    %c0_i32_1 = arith.constant 0 : i32
    return %c0_i32, %c0_i32_0 : i32, i32
  }
  func.func @transform_2(%arg0: i32) -> (i32, i32) {
    %c0_i32 = arith.constant 0 : i32
    %c0_i32_0 = arith.constant 0 : i32
    %c0_i32_1 = arith.constant 0 : i32
    return %c0_i32, %c0_i32_0 : i32, i32
  }
  func.func @transform_3(%arg0: i32) -> (i32, i32) {
    %c0_i32 = arith.constant 0 : i32
    %c0_i32_0 = arith.constant 0 : i32
    %c0_i32_1 = arith.constant 0 : i32
    return %c0_i32, %c0_i32_0 : i32, i32
  }
  func.func @transform_4(%arg0: i32) -> (i32, i32) {
    %c0_i32 = arith.constant 0 : i32
    %c0_i32_0 = arith.constant 0 : i32
    %c0_i32_1 = arith.constant 0 : i32
    return %c0_i32, %c0_i32_0 : i32, i32
  }
  func.func @transform_5(%arg0: i32) -> (i32, i32) {
    %c0_i32 = arith.constant 0 : i32
    %c0_i32_0 = arith.constant 0 : i32
    %c0_i32_1 = arith.constant 0 : i32
    return %c0_i32, %c0_i32_0 : i32, i32
  }
  func.func @transform_6(%arg0: i32) -> (i32, i32) {
    %c0_i32 = arith.constant 0 : i32
    %c0_i32_0 = arith.constant 0 : i32
    %c0_i32_1 = arith.constant 0 : i32
    return %c0_i32, %c0_i32_0 : i32, i32
  }
  func.func @transform_7(%arg0: i32) -> (i32, i32) {
    %c0_i32 = arith.constant 0 : i32
    %c0_i32_0 = arith.constant 0 : i32
    %c0_i32_1 = arith.constant 0 : i32
    return %c0_i32, %c0_i32_0 : i32, i32
  }
  func.func @transform_8(%arg0: i32) -> (i32, i32) {
    %c0_i32 = arith.constant 0 : i32
    %c0_i32_0 = arith.constant 0 : i32
    %c0_i32_1 = arith.constant 0 : i32
    return %c0_i32, %c0_i32_0 : i32, i32
  }
  func.func @transform_9(%arg0: i32) -> (i32, i32) {
    %c0_i32 = arith.constant 0 : i32
    %c0_i32_0 = arith.constant 0 : i32
    %c0_i32_1 = arith.constant 0 : i32
    return %c0_i32, %c0_i32_0 : i32, i32
  }
  func.func @transform_10(%arg0: i32) -> (i32, i32) {
    %c0_i32 = arith.constant 0 : i32
    %c0_i32_0 = arith.constant 0 : i32
    %c0_i32_1 = arith.constant 0 : i32
    return %c0_i32, %c0_i32_0 : i32, i32
  }
  func.func @transform_11(%arg0: i32) -> (i32, i32) {
    %c0_i32 = arith.constant 0 : i32
    %c0_i32_0 = arith.constant 0 : i32
    %c0_i32_1 = arith.constant 0 : i32
    return %c0_i32, %c0_i32_0 : i32, i32
  }
  func.func @transform_12(%arg0: i32) -> (i32, i32) {
    %c0_i32 = arith.constant 0 : i32
    %c0_i32_0 = arith.constant 0 : i32
    %c0_i32_1 = arith.constant 0 : i32
    return %c0_i32, %c0_i32_0 : i32, i32
  }
  func.func @transform_13(%arg0: i32) -> (i32, i32) {
    %c0_i32 = arith.constant 0 : i32
    %c0_i32_0 = arith.constant 0 : i32
    %c0_i32_1 = arith.constant 0 : i32
    return %c0_i32, %c0_i32_0 : i32, i32
  }
  func.func @transform_14(%arg0: i32) -> (i32, i32) {
    %c0_i32 = arith.constant 0 : i32
    %c0_i32_0 = arith.constant 0 : i32
    %c0_i32_1 = arith.constant 0 : i32
    return %c0_i32, %c0_i32_0 : i32, i32
  }
  func.func @transform_15(%arg0: i32) -> (i32, i32) {
    %c0_i32 = arith.constant 0 : i32
    %c0_i32_0 = arith.constant 0 : i32
    %c0_i32_1 = arith.constant 0 : i32
    return %c0_i32, %c0_i32_0 : i32, i32
  }
}

</mosaic_0001>

<bundles_post_ra>
// kernel: lstm_classifier2_forward.1
= control target key start
LH: loop header
LB: loop body
LE: loop exit
PB: predicated region body
PF: predicated region fallthrough
CT: control target
= control target key end

     0   :  { %vm67_vm0 = vcmask 130048   ;;  %v2031_v17 = vmov 0   ;;  %v254_v56 = vlaneseq  ;;  %v2032_v61 = vmov 1.0   ;;  %s2035_s18 = smov 32   ;;  %s2036_s17 = smov 88   ;;  %s2636_s2 = inlined_call_operand.vmem [shape: f32[16,256], index: 2, kind: input, shape index: {}]   ;;  %s2637_s1 = inlined_call_operand.vmem [shape: f32[128,16], index: 1, kind: input, shape index: {}]   ;;  %s2638_s0 = inlined_call_operand.vmem [shape: s32[64,1], index: 0, kind: input, shape index: {}]   ;;  %s2639_s4 = inlined_call_operand.vmem [shape: f32[32,128], index: 4, kind: input, shape index: {}]   ;;  %s2640_s3 = inlined_call_operand.vmem [shape: f32[1,256], index: 3, kind: input, shape index: {}]   ;;  %s2641_s6 = inlined_call_operand.vmem [shape: f32[32,128], index: 6, kind: input, shape index: {}]   ;;  %s2642_s7 = inlined_call_operand.vmem [shape: f32[1,128], index: 7, kind: input, shape index: {}]   ;;  %s2643_s9 = inlined_call_operand.vmem [shape: f32[40,32], index: 9, kind: input, shape index: {}]   ;;  %s2644_s14 = inlined_call_operand.vmem [shape: f32[8,128], index: 14, kind: output, shape index: {1}]   ;;  %s2645_s10 = inlined_call_operand.vmem [shape: f32[1,32], index: 10, kind: input, shape index: {}]   ;;  %s2646_s5 = inlined_call_operand.vmem [shape: f32[32,128], index: 5, kind: input, shape index: {}]   ;;  %s2647_s8 = inlined_call_operand.vmem [shape: f32[8,40], index: 8, kind: input, shape index: {}]   ;;  %s2648_s15 = inlined_call_operand.vmem [shape: f32[8,40], index: 15, kind: output, shape index: {2}]   ;;  %s2649_s11 = inlined_call_operand.vmem [shape: f32[32,128], index: 11, kind: input, shape index: {}]   ;;  %s2650_s12 = inlined_call_operand.vmem [shape: f32[1,128], index: 12, kind: input, shape index: {}]   ;;  %s2651_s13 = inlined_call_operand.vmem [shape: f32[64,128], index: 13, kind: output, shape index: {0}]  }
   0x1   :  { %v65_v0 = vld [vmem:[%s2636_s2 + $0x10] sm:$0xff]  ;;  %v63_v1 = vld [vmem:[%s2636_s2] sm:$0xff]  ;;  %v2129_v3 = vld [vmem:[%s2637_s1 + $0x58] sm:$0xff]  ;;  %1863 = vset.pattern.permute.xlu0 %v2031_v17  ;;  %1864 = vset.pattern.permute.xlu1 %v2031_v17  ;;  %vm413_vm13 = vcmask 261120  }
   0x2   :  { %130 = vmatpush.msra.mxu0 %v65_v0  ;;  %1853 = vmatpush.msra.mxu1 %v65_v0  ;;  %v47_v2 = vld [vmem:[%s2637_s1] sm:$0xff]  ;;  %v66_v4 = vld [vmem:[%s2636_s2 + $0x18] sm:$0xff]  ;;  %v64_v6 = vld [vmem:[%s2636_s2 + $0x8] sm:$0xff]  ;;  %v2257_v57 = vand.u32 127, %v254_v56 }
   0x3   :  { %1854 = vmatpush.msra.mxu2 %v65_v0  ;;  %v2137_v5 = vld [vmem:[%s2637_s1 + $0x60] sm:$0xff]  ;;  %v48_v7 = vld [vmem:[%s2637_s1 + $0x8] sm:$0xff]  ;;  %v49_v9 = vld [vmem:[%s2637_s1 + $0x10] sm:$0xff]  ;;  %1865 = vset.pattern.permute.xlu2 %v2031_v17 }
   0x4   :  { %131 = vmatpush.msra.mxu0 %v63_v1  ;;  %1855 = vmatpush.msra.mxu1 %v63_v1  ;;  %v60_v8 = vld [vmem:[%s2637_s1 + $0x68] sm:$0xff]  ;;  %v61_v10 = vld [vmem:[%s2637_s1 + $0x70] sm:$0xff]  ;;  %v50_v11 = vld [vmem:[%s2637_s1 + $0x18] sm:$0xff] }
   0x5   :  { %1756 = vmatmul.msk.f32.vlgmr.msra.gmra.mxu0 %vm67_vm0, %v47_v2  ;;  %1767 = vmatmul.msk.f32.vlgmr.msra.gmra.mxu1 %vm67_vm0, %v2129_v3  ;;  %v62_v12 = vld [vmem:[%s2637_s1 + $0x78] sm:$0xff]  ;;  %v51_v13 = vld [vmem:[%s2637_s1 + $0x20] sm:$0xff]  ;;  %v52_v14 = vld [vmem:[%s2637_s1 + $0x28] sm:$0xff] }
   0x6   :  { %195 = vmatpush.msrb.mxu1 %v66_v4  ;;  %1856 = vmatpush.msra.mxu2 %v63_v1  ;;  %v53_v15 = vld [vmem:[%s2637_s1 + $0x30] sm:$0xff]  ;;  %v54_v16 = vld [vmem:[%s2637_s1 + $0x38] sm:$0xff]  ;;  %v55_v18 = vld [vmem:[%s2637_s1 + $0x40] sm:$0xff] }
   0x7   :  { %1768 = vmatmul.msk.f32.vlgmr.msra.gmra.mxu2 %vm67_vm0, %v2137_v5  ;;  %v246_v19 = vld [vmem:[%s2638_s0] sm:$0xff]  ;;  %v56_v20 = vld [vmem:[%s2637_s1 + $0x48] sm:$0xff]  ;;  %v57_v22 = vld [vmem:[%s2637_s1 + $0x50] sm:$0xff] }
   0x8   :  { %196 = vmatpush.msrb.mxu1 %v64_v6  ;;  %257 = vperm.xlu0 %1863, %v246_v19   ;;  %v247_v21 = vld [vmem:[%s2638_s0 + $0x8] sm:$0xff]  ;;  %v248_v23 = vld [vmem:[%s2638_s0 + $0x10] sm:$0xff]  ;;  %v249_v25 = vld [vmem:[%s2638_s0 + $0x18] sm:$0xff] }
   0x9   :  { %v252_v24 = vld [vmem:[%s2638_s0 + $0x30] sm:$0xff]  ;;  %263 = vperm.xlu1 %1864, %v248_v23   ;;  %v253_v26 = vld [vmem:[%s2638_s0 + $0x38] sm:$0xff]  ;;  %v250_v29 = vld [vmem:[%s2638_s0 + $0x20] sm:$0xff] }
   0xa   :  { %269 = vperm.xlu2 %1865, %v250_v29   ;;  %v251_v32 = vld [vmem:[%s2638_s0 + $0x28] sm:$0xff]  ;;  %v2263_v60 = vld [vmem:[%s2639_s4 + $0x18] sm:$0xff]  ;;  %v2271_v62 = vld [vmem:[%s2639_s4 + $0x10] sm:$0xff] }
   0xb   :  { %v2277_v0 = vld [vmem:[%s2639_s4 + $0x8] sm:$0xff]  ;;  %v2292_v4 = vld [vmem:[%s2639_s4] sm:$0xff] }
   0xd   :  { %1757 = vmatmul.msk.f32.gmra.mxu0 %vm67_vm0, %v48_v7  ;;  %1772 = vmatmul.msk.f32.vlgmr.msrb.gmra.mxu1 %vm67_vm0, %v47_v2 }
   0xf   :  { %1769 = vmatmul.msk.f32.gmra.mxu2 %vm67_vm0, %v60_v8 }
  0x10   :  { %260 = vperm.xlu0 %1863, %v247_v21  }
  0x11   :  { %266 = vperm.xlu1 %1864, %v249_v25  }
  0x12   :  { %272 = vperm.xlu2 %1865, %v251_v32  }
  0x15   :  { %1758 = vmatmul.msk.f32.gmra.mxu0 %vm67_vm0, %v49_v9  ;;  %1773 = vmatmul.msk.f32.gmra.mxu1 %vm67_vm0, %v48_v7 }
  0x17   :  { %1770 = vmatmul.msk.f32.gmra.mxu2 %vm67_vm0, %v61_v10 }
  0x18   :  { %275 = vperm.xlu0 %1863, %v252_v24  }
  0x19   :  { %278 = vperm.xlu1 %1864, %v253_v26  }
  0x1d   :  { %1759 = vmatmul.msk.f32.gmra.mxu0 %vm67_vm0, %v50_v11  ;;  %1774 = vmatmul.msk.f32.gmra.mxu1 %vm67_vm0, %v49_v9 }
  0x1f   :  { %1771 = vmatmul.msk.f32.gmra.mxu2 %vm67_vm0, %v62_v12 }
  0x25   :  { %1760 = vmatmul.msk.f32.gmra.mxu0 %vm67_vm0, %v51_v13  ;;  %1775 = vmatmul.msk.f32.gmra.mxu1 %vm67_vm0, %v50_v11 }
  0x2d   :  { %1761 = vmatmul.msk.f32.gmra.mxu0 %vm67_vm0, %v52_v14  ;;  %1776 = vmatmul.msk.f32.gmra.mxu1 %vm67_vm0, %v51_v13 }
  0x35   :  { %1762 = vmatmul.msk.f32.gmra.mxu0 %vm67_vm0, %v53_v15  ;;  %1777 = vmatmul.msk.f32.gmra.mxu1 %vm67_vm0, %v52_v14  ;;  %v304_v14 = vld [vmem:[%s2640_s3] sm:$0x3]  ;;  %s2034_s3 = smov 64  }
  0x3d   :  { %1763 = vmatmul.msk.f32.gmra.mxu0 %vm67_vm0, %v54_v16  ;;  %1778 = vmatmul.msk.f32.gmra.mxu1 %vm67_vm0, %v53_v15  ;;  %v306_v15 = vperm.slane %v304_v14, 0 }
  0x45   :  { %1764 = vmatmul.msk.f32.gmra.mxu0 %vm67_vm0, %v55_v18  ;;  %1779 = vmatmul.msk.f32.gmra.mxu1 %vm67_vm0, %v54_v16 }
  0x4d   :  { %1765 = vmatmul.msk.f32.gmra.mxu0 %vm67_vm0, %v56_v20  ;;  %1780 = vmatmul.msk.f32.gmra.mxu1 %vm67_vm0, %v55_v18 }
  0x55   :  { %1766 = vmatmul.msk.f32.gmra.mxu0 %vm67_vm0, %v57_v22  ;;  %1781 = vmatmul.msk.f32.gmra.mxu1 %vm67_vm0, %v56_v20 }
  0x5d   :  { %1782 = vmatmul.msk.f32.gmra.mxu1 %vm67_vm0, %v57_v22 }
  0x64   :  { %v270_v7 = vpop.permute.xlu2 %269 }
  0x65   :  { %1783 = vmatmul.msk.f32.gmra.mxu1 %vm67_vm0, %v2129_v3  ;;  %vm284_vm5 = vcmp.eq.s32.totalorder %v2257_v57, %v270_v7 }
  0x6c   :  { %v273_v9 = vpop.permute.xlu2 %272 }
  0x6d   :  { %1784 = vmatmul.msk.f32.gmra.mxu1 %vm67_vm0, %v2137_v5  ;;  %vm285_vm6 = vcmp.eq.s32.totalorder %v2257_v57, %v273_v9 }
  0x75   :  { %1785 = vmatmul.msk.f32.gmra.mxu1 %vm67_vm0, %v60_v8 }
  0x7a   :  { %v258_v59 = vpop.permute.xlu0 %257 }
  0x7b   :  { %vm280_vm1 = vcmp.eq.s32.totalorder %v2257_v57, %v258_v59  ;;  %v264_v3 = vpop.permute.xlu1 %263 }
  0x7c   :  { %vm282_vm3 = vcmp.eq.s32.totalorder %v2257_v57, %v264_v3 }
  0x7d   :  { %1786 = vmatmul.msk.f32.gmra.mxu1 %vm67_vm0, %v61_v10 }
  0x82   :  { %v133_v27 = vpop.f32.mrf.mxu0  ;;  %v166_v28 = vpop.f32.mrf.mxu1 }
  0x83   :  { %v261_v1 = vpop.permute.xlu0 %260  ;;  %v267_v6 = vpop.permute.xlu1 %266 }
  0x84   :  { %vm281_vm2 = vcmp.eq.s32.totalorder %v2257_v57, %v261_v1  ;;  %vm283_vm4 = vcmp.eq.s32.totalorder %v2257_v57, %v267_v6 }
  0x85   :  { %1787 = vmatmul.msk.f32.gmra.mxu1 %vm67_vm0, %v62_v12  ;;  %v2033_v12 = vmov 0.0  }
  0x8a   :  { %v136_v30 = vpop.f32.mrf.mxu0  ;;  %v2238_v31 = vpop.f32.mrf.mxu1 }
  0x8b   :  { %v169_v33 = vpop.f32.mrf.mxu2  ;;  %v276_v10 = vpop.permute.xlu0 %275 }
  0x8c   :  { %vm286_vm7 = vcmp.eq.s32.totalorder %v2257_v57, %v276_v10  ;;  %v279_v11 = vpop.permute.xlu1 %278 }
  0x8d   :  { %vm287_vm8 = vcmp.eq.s32.totalorder %v2257_v57, %v279_v11 }
  0x92   :  { %v139_v34 = vpop.f32.mrf.mxu0  ;;  %v2243_v35 = vpop.f32.mrf.mxu1 }
  0x93   :  { %v172_v36 = vpop.f32.mrf.mxu2 }
  0x9a   :  { %v142_v37 = vpop.f32.mrf.mxu0  ;;  %v2245_v38 = vpop.f32.mrf.mxu1 }
  0x9b   :  { %v175_v39 = vpop.f32.mrf.mxu2 }
  0xa2   :  { %v145_v40 = vpop.f32.mrf.mxu0  ;;  %v2247_v41 = vpop.f32.mrf.mxu1 }
  0xa3   :  { %v178_v42 = vpop.f32.mrf.mxu2 }
  0xa4   :  { %310 = vmatpush.msrb.mxu2 %v178_v42 }
  0xa6   :  { %311 = vmatpush.msrb.mxu2 %v175_v39 }
  0xa8   :  { %312 = vmatpush.msrb.mxu2 %v172_v36 }
  0xaa   :  { %v148_v43 = vpop.f32.mrf.mxu0  ;;  %v2249_v44 = vpop.f32.mrf.mxu1  ;;  %313 = vmatpush.msrb.mxu2 %v169_v33  ;;  %v2382_v33 = vperm.slane %v304_v14, 1 }
  0xac   :  { %314 = vmatpush.msrb.mxu2 %v166_v28 }
  0xb2   :  { %v151_v45 = vpop.f32.mrf.mxu0  ;;  %v2251_v46 = vpop.f32.mrf.mxu1 }
  0xba   :  { %v154_v47 = vpop.f32.mrf.mxu0  ;;  %v2253_v48 = vpop.f32.mrf.mxu1 }
  0xc2   :  { %v157_v49 = vpop.f32.mrf.mxu0  ;;  %v2255_v50 = vpop.f32.mrf.mxu1 }
  0xca   :  { %v160_v51 = vpop.f32.mrf.mxu0  ;;  %v222_v52 = vpop.f32.mrf.mxu1 }
  0xd2   :  { %v163_v53 = vpop.f32.mrf.mxu0  ;;  %v225_v54 = vpop.f32.mrf.mxu1 }
  0xd3   :  { %315 = vmatpush.msrb.mxu2 %v163_v53 }
  0xd5   :  { %316 = vmatpush.msrb.mxu2 %v160_v51 }
  0xd7   :  { %317 = vmatpush.msrb.mxu2 %v157_v49 }
  0xd9   :  { %318 = vmatpush.msrb.mxu2 %v154_v47 }
  0xda   :  { %v228_v55 = vpop.f32.mrf.mxu1 }
  0xdb   :  { %319 = vmatpush.msrb.mxu2 %v151_v45 }
  0xdd   :  { %320 = vmatpush.msrb.mxu2 %v148_v43 }
  0xdf   :  { %321 = vmatpush.msrb.mxu2 %v145_v40 }
  0xe1   :  { %322 = vmatpush.msrb.mxu2 %v142_v37 }
  0xe2   :  { %v231_v58 = vpop.f32.mrf.mxu1 }
  0xe3   :  { %323 = vmatpush.msrb.mxu2 %v139_v34 }
  0xe5   :  { %324 = vmatpush.msrb.mxu2 %v136_v30 }
  0xe7   :  { %325 = vmatpush.msrb.mxu2 %v133_v27 }
  0xe8   :  { %1796 = vmatmul.msk.f32.vlgmr.msrb.gmra.mxu2 %vm280_vm1, %v2032_v61 }
  0xe9   :  { %429 = vmatpush.msra.mxu2 %v2263_v60 }
  0xea   :  { %v234_v63 = vpop.f32.mrf.mxu1 }
  0xeb   :  { %430 = vmatpush.msra.mxu2 %v2271_v62 }
  0xed   :  { %431 = vmatpush.msra.mxu2 %v2277_v0 }
  0xef   :  { %432 = vmatpush.msra.mxu2 %v2292_v4 }
  0xf0   :  { %1797 = vmatmul.msk.f32.gmra.mxu2 %vm281_vm2, %v2032_v61 }
  0xf1   :  { %559 = vmatpush.msrb.mxu2 %v2263_v60 }
  0xf2   :  { %v237_v2 = vpop.f32.mrf.mxu1 }
  0xf3   :  { %560 = vmatpush.msrb.mxu2 %v2271_v62 }
  0xf5   :  { %561 = vmatpush.msrb.mxu2 %v2277_v0 }
  0xf7   :  { %562 = vmatpush.msrb.mxu2 %v2292_v4 }
  0xf8   :  { %1798 = vmatmul.msk.f32.gmra.mxu2 %vm282_vm3, %v2032_v61 }
  0xfa   :  { %v240_v5 = vpop.f32.mrf.mxu1 }
 0x100   :  { %1799 = vmatmul.msk.f32.gmra.mxu2 %vm283_vm4, %v2032_v61 }
 0x102   :  { %v243_v8 = vpop.f32.mrf.mxu1 }
 0x103   :  { %351 = vmatpush.msra.mxu3 %v243_v8 }
 0x105   :  { %352 = vmatpush.msra.mxu3 %v240_v5 }
 0x107   :  { %353 = vmatpush.msra.mxu3 %v237_v2 }
 0x108   :  { %1800 = vmatmul.msk.f32.gmra.mxu2 %vm284_vm5, %v2032_v61 }
 0x109   :  { %354 = vmatpush.msra.mxu3 %v234_v63 }
 0x10b   :  { %355 = vmatpush.msra.mxu3 %v231_v58 }
 0x10d   :  { %356 = vmatpush.msra.mxu3 %v228_v55 }
 0x10f   :  { %357 = vmatpush.msra.mxu3 %v225_v54 }
 0x110   :  { %1801 = vmatmul.msk.f32.gmra.mxu2 %vm285_vm6, %v2032_v61 }
 0x111   :  { %358 = vmatpush.msra.mxu3 %v222_v52 }
 0x113   :  { %359 = vmatpush.msra.mxu3 %v2255_v50 }
 0x115   :  { %360 = vmatpush.msra.mxu3 %v2253_v48 }
 0x117   :  { %361 = vmatpush.msra.mxu3 %v2251_v46 }
 0x118   :  { %1802 = vmatmul.msk.f32.gmra.mxu2 %vm286_vm7, %v2032_v61 }
 0x119   :  { %362 = vmatpush.msra.mxu3 %v2249_v44 }
 0x11b   :  { %363 = vmatpush.msra.mxu3 %v2247_v41 }
 0x11d   :  { %364 = vmatpush.msra.mxu3 %v2245_v38 }
 0x11f   :  { %365 = vmatpush.msra.mxu3 %v2243_v35 }
 0x120   :  { %1803 = vmatmul.msk.f32.gmra.mxu2 %vm287_vm8, %v2032_v61 }
 0x121   :  { %366 = vmatpush.msra.mxu3 %v2238_v31 }
 0x122   :  { %1804 = vmatmul.msk.f32.vlgmr.msra.gmra.mxu3 %vm280_vm1, %v2032_v61 }
 0x123   :  { %494 = vmatpush.msrb.mxu3 %v2263_v60 }
 0x125   :  { %495 = vmatpush.msrb.mxu3 %v2271_v62 }
 0x127   :  { %496 = vmatpush.msrb.mxu3 %v2277_v0 }
 0x128   :  { %433 = vmatmul.f32.vlgmr.msra.gmra.mxu2 %v2033_v12 }
 0x129   :  { %497 = vmatpush.msrb.mxu3 %v2292_v4  ;;  %689 = vmatpush.msra.mxu2 %v2263_v60 }
 0x12a   :  { %1805 = vmatmul.msk.f32.gmra.mxu3 %vm281_vm2, %v2032_v61 }
 0x12b   :  { %624 = vmatpush.msra.mxu3 %v2263_v60  ;;  %690 = vmatpush.msra.mxu2 %v2271_v62 }
 0x12d   :  { %625 = vmatpush.msra.mxu3 %v2271_v62  ;;  %691 = vmatpush.msra.mxu2 %v2277_v0 }
 0x12f   :  { %626 = vmatpush.msra.mxu3 %v2277_v0  ;;  %692 = vmatpush.msra.mxu2 %v2292_v4 }
 0x131   :  { %627 = vmatpush.msra.mxu3 %v2292_v4 }
 0x132   :  { %1806 = vmatmul.msk.f32.gmra.mxu3 %vm282_vm3, %v2032_v61 }
 0x13a   :  { %1807 = vmatmul.msk.f32.gmra.mxu3 %vm283_vm4, %v2032_v61 }
 0x142   :  { %1808 = vmatmul.msk.f32.gmra.mxu3 %vm284_vm5, %v2032_v61 }
 0x14a   :  { %1809 = vmatmul.msk.f32.gmra.mxu3 %vm285_vm6, %v2032_v61 }
 0x152   :  { %1810 = vmatmul.msk.f32.gmra.mxu3 %vm286_vm7, %v2032_v61 }
 0x15a   :  { %1811 = vmatmul.msk.f32.gmra.mxu3 %vm287_vm8, %v2032_v61 }
 0x16b   :  { %v327_v13 = vpop.f32.mrf.mxu2 }
 0x16c   :  { %v328_v31 = vadd.f32 %v327_v13, %v306_v15 }
 0x173   :  { %v330_v16 = vpop.f32.mrf.mxu2 }
 0x174   :  { %v2366_v17 = vadd.f32 %v330_v16, %v306_v15 }
 0x17b   :  { %v333_v18 = vpop.f32.mrf.mxu2 }
 0x17c   :  { %v2368_v19 = vadd.f32 %v333_v18, %v306_v15 }
 0x183   :  { %v336_v20 = vpop.f32.mrf.mxu2 }
 0x184   :  { %v2370_v21 = vadd.f32 %v336_v20, %v306_v15 }
 0x18b   :  { %v339_v22 = vpop.f32.mrf.mxu2 }
 0x18c   :  { %v2372_v23 = vadd.f32 %v339_v22, %v306_v15 }
 0x193   :  { %v342_v24 = vpop.f32.mrf.mxu2 }
 0x194   :  { %v2374_v25 = vadd.f32 %v342_v24, %v306_v15 }
 0x19b   :  { %v345_v26 = vpop.f32.mrf.mxu2 }
 0x19c   :  { %v2376_v27 = vadd.f32 %v345_v26, %v306_v15 }
 0x1a3   :  { %v348_v28 = vpop.f32.mrf.mxu2 }
 0x1a4   :  { %v2378_v29 = vadd.f32 %v348_v28, %v306_v15 }
 0x1a5   :  { %v2380_v30 = vpop.f32.mrf.mxu3 }
 0x1ab   :  { %v434_v32 = vpop.f32.mrf.mxu2 }
 0x1ac   :  { %v437_v34 = vadd.f32 %v434_v32, %v328_v31 }
 0x1ad   :  { %v371_v35 = vpop.f32.mrf.mxu3 }
 0x1ae   :  { %1869 = vtanh.f32 %v437_v34  ;;  %v2385_v36 = vadd.f32 %v371_v35, %v2382_v33  ;;  %v1812_v48 = vmul.f32 -1.442695, %v437_v34 }
 0x1b0   :  { %1871 = vpow2.f32 %v1812_v48 }
 0x1b4   :  { %v1870_v37 = vpop.eup %1869 }
 0x1b5   :  { %v374_v38 = vpop.f32.mrf.mxu3  ;;  %460 = vrot.lane.b32.xlu2 %v1870_v37, %s2034_s3 }
 0x1b6   :  { %v2389_v39 = vadd.f32 %v374_v38, %v2382_v33  ;;  %v1872_v49 = vpop.eup %1871 }
 0x1b7   :  { %v441_v50 = vadd.f32 1.0, %v1872_v49 }
 0x1b9   :  { %1873 = vrcp.f32 %v441_v50  ;;  %v453_v56 = vand.u32 2147483648, %v441_v50  ;;  %vm447_vm10 = vweird.f32 %v441_v50  ;;  %v451_v57 = vand.u32 2147483647, %v441_v50 }
 0x1bb   :  { %v454_v59 = vor.u32 1.1754944e-38, %v453_v56  ;;  %vm452_vm12 = vcmp.eq.f32.partialorder %v451_v57, 8.507059e+37 }
 0x1bd   :  { %v377_v40 = vpop.f32.mrf.mxu3 }
 0x1be   :  { %v2392_v41 = vadd.f32 %v377_v40, %v2382_v33 }
 0x1bf   :  { %v1874_v51 = vpop.eup %1873 }
 0x1c0   :  { %v443_v52 = vmul.f32 %v1874_v51, %v441_v50  ;;  %vm448_vm9 = vweird.f32 %v1874_v51 }
 0x1c1   :  { %vm449_vm11 = vmor %vm447_vm10, %vm448_vm9 }
 0x1c2   :  { %v444_v53 = vsub.f32 1.0, %v443_v52 }
 0x1c4   :  { %v445_v54 = vmul.f32 %v1874_v51, %v444_v53 }
 0x1c5   :  { %v380_v42 = vpop.f32.mrf.mxu3 }
 0x1c6   :  { %v2395_v43 = vadd.f32 %v380_v42, %v2382_v33  ;;  %v446_v55 = vadd.f32 %v1874_v51, %v445_v54 }
 0x1c8   :  { %v450_v58 = vsel %vm449_vm11, %v1874_v51, %v446_v55 }
 0x1c9   :  { %v455_v63 = vsel %vm452_vm12, %v454_v59, %v450_v58 }
 0x1ca   :  { %v458_v2 = vmul.f32 0.0, %v455_v63 }
 0x1cd   :  { %v383_v44 = vpop.f32.mrf.mxu3 }
 0x1ce   :  { %v2398_v45 = vadd.f32 %v383_v44, %v2382_v33 }
 0x1d5   :  { %v386_v46 = vpop.f32.mrf.mxu3 }
 0x1d6   :  { %v2401_v47 = vadd.f32 %v386_v46, %v2382_v33 }
 0x1dd   :  { %v2411_v10 = vpop.f32.mrf.mxu3 }
 0x20f   :  { %v461_v61 = vpop.permute.xlu2 %460 }
 0x210   :  { %v463_v1 = vmul.f32 %v461_v61, %v455_v63 }
 0x212   :  { %465 = vrot.lane.b32.xlu0 %v463_v1, %s2035_s18 }
 0x284   :  { %v466_v3 = vpop.permute.xlu0 %465 }
 0x285   :  { %v468_v5 = vadd.f32 %v466_v3, %v458_v2 }
 0x287   :  { %1875 = vtanh.f32 %v468_v5 }
 0x28d   :  { %v1876_v6 = vpop.eup %1875 }
 0x28e   :  { %471 = vrot.lane.b32.xlu1 %v1876_v6, %s2034_s3 }
 0x300   :  { %v472_v7 = vpop.permute.xlu1 %471 }
 0x301   :  { %v474_v8 = vmul.f32 %v472_v7, %v455_v63 }
 0x303   :  { %478 = vrot.lane.b32.xlu2 %v474_v8, %s2035_s18 }
 0x35d   :  { %v479_v9 = vpop.permute.xlu2 %478 }
 0x35e   :  { %1813 = vmatmul.msk.f32.vlgmr.msrb.gmra.mxu3 %vm413_vm13, %v479_v9 }
 0x35f   :  { %754 = vmatpush.msrb.mxu3 %v2263_v60 }
 0x361   :  { %755 = vmatpush.msrb.mxu3 %v2271_v62 }
 0x363   :  { %756 = vmatpush.msrb.mxu3 %v2277_v0 }
 0x365   :  { %757 = vmatpush.msrb.mxu3 %v2292_v4 }
 0x3e1   :  { %v499_v11 = vpop.f32.mrf.mxu3 }
 0x3e2   :  { %v502_v12 = vadd.f32 %v499_v11, %v2366_v17 }
 0x3e4   :  { %1877 = vtanh.f32 %v502_v12  ;;  %v1814_v14 = vmul.f32 -1.442695, %v502_v12 }
 0x3e6   :  { %1879 = vpow2.f32 %v1814_v14 }
 0x3ea   :  { %v1878_v13 = vpop.eup %1877 }
 0x3eb   :  { %525 = vrot.lane.b32.xlu0 %v1878_v13, %s2034_s3 }
 0x3ec   :  { %v1880_v15 = vpop.eup %1879 }
 0x3ed   :  { %v506_v16 = vadd.f32 1.0, %v1880_v15 }
 0x3ef   :  { %1881 = vrcp.f32 %v506_v16  ;;  %v518_v28 = vand.u32 2147483648, %v506_v16  ;;  %vm512_vm15 = vweird.f32 %v506_v16  ;;  %v516_v31 = vand.u32 2147483647, %v506_v16 }
 0x3f1   :  { %v519_v32 = vor.u32 1.1754944e-38, %v518_v28  ;;  %vm517_vm1 = vcmp.eq.f32.partialorder %v516_v31, 8.507059e+37 }
 0x3f5   :  { %v1882_v18 = vpop.eup %1881 }
 0x3f6   :  { %v508_v20 = vmul.f32 %v1882_v18, %v506_v16  ;;  %vm513_vm14 = vweird.f32 %v1882_v18 }
 0x3f7   :  { %vm514_vm0 = vmor %vm512_vm15, %vm513_vm14 }
 0x3f8   :  { %v509_v22 = vsub.f32 1.0, %v508_v20 }
 0x3fa   :  { %v510_v24 = vmul.f32 %v1882_v18, %v509_v22 }
 0x3fc   :  { %v511_v26 = vadd.f32 %v1882_v18, %v510_v24 }
 0x3fe   :  { %v515_v17 = vsel %vm514_vm0, %v1882_v18, %v511_v26 }
 0x3ff   :  { %v520_v35 = vsel %vm517_vm1, %v519_v32, %v515_v17 }
 0x400   :  { %v523_v38 = vmul.f32 %v520_v35, %v468_v5 }
 0x45d   :  { %v526_v34 = vpop.permute.xlu0 %525 }
 0x45e   :  { %v528_v37 = vmul.f32 %v526_v34, %v520_v35 }
 0x460   :  { %530 = vrot.lane.b32.xlu1 %v528_v37, %s2035_s18 }
 0x4d2   :  { %v531_v40 = vpop.permute.xlu1 %530 }
 0x4d3   :  { %v533_v42 = vadd.f32 %v531_v40, %v523_v38 }
 0x4d5   :  { %1883 = vtanh.f32 %v533_v42 }
 0x4db   :  { %v1884_v44 = vpop.eup %1883 }
 0x4dc   :  { %536 = vrot.lane.b32.xlu2 %v1884_v44, %s2034_s3 }
 0x536   :  { %v537_v46 = vpop.permute.xlu2 %536 }
 0x537   :  { %v539_v48 = vmul.f32 %v537_v46, %v520_v35 }
 0x539   :  { %543 = vrot.lane.b32.xlu0 %v539_v48, %s2035_s18 }
 0x5ab   :  { %v544_v49 = vpop.permute.xlu0 %543 }
 0x5ac   :  { %1815 = vmatmul.msk.f32.vlgmr.msrb.gmra.mxu2 %vm413_vm13, %v544_v49 }
 0x5ad   :  { %819 = vmatpush.msrb.mxu2 %v2263_v60 }
 0x5af   :  { %820 = vmatpush.msrb.mxu2 %v2271_v62 }
 0x5b1   :  { %821 = vmatpush.msrb.mxu2 %v2277_v0 }
 0x5b3   :  { %822 = vmatpush.msrb.mxu2 %v2292_v4 }
 0x62f   :  { %v564_v50 = vpop.f32.mrf.mxu2 }
 0x630   :  { %v567_v51 = vadd.f32 %v564_v50, %v2368_v19 }
 0x632   :  { %1885 = vtanh.f32 %v567_v51  ;;  %v1816_v53 = vmul.f32 -1.442695, %v567_v51 }
 0x634   :  { %1887 = vpow2.f32 %v1816_v53 }
 0x638   :  { %v1886_v52 = vpop.eup %1885 }
 0x639   :  { %590 = vrot.lane.b32.xlu1 %v1886_v52, %s2034_s3 }
 0x63a   :  { %v1888_v54 = vpop.eup %1887 }
 0x63b   :  { %v571_v55 = vadd.f32 1.0, %v1888_v54 }
 0x63d   :  { %1889 = vrcp.f32 %v571_v55  ;;  %v583_v63 = vand.u32 2147483648, %v571_v55  ;;  %vm577_vm3 = vweird.f32 %v571_v55  ;;  %v581_v1 = vand.u32 2147483647, %v571_v55 }
 0x63f   :  { %v584_v2 = vor.u32 1.1754944e-38, %v583_v63  ;;  %vm582_vm5 = vcmp.eq.f32.partialorder %v581_v1, 8.507059e+37 }
 0x643   :  { %v1890_v56 = vpop.eup %1889 }
 0x644   :  { %v573_v57 = vmul.f32 %v1890_v56, %v571_v55  ;;  %vm578_vm2 = vweird.f32 %v1890_v56 }
 0x645   :  { %vm579_vm4 = vmor %vm577_vm3, %vm578_vm2 }
 0x646   :  { %v574_v58 = vsub.f32 1.0, %v573_v57 }
 0x648   :  { %v575_v59 = vmul.f32 %v1890_v56, %v574_v58 }
 0x64a   :  { %v576_v61 = vadd.f32 %v1890_v56, %v575_v59 }
 0x64c   :  { %v580_v19 = vsel %vm579_vm4, %v1890_v56, %v576_v61 }
 0x64d   :  { %v585_v5 = vsel %vm582_vm5, %v584_v2, %v580_v19 }
 0x64e   :  { %v588_v7 = vmul.f32 %v585_v5, %v533_v42 }
 0x6ab   :  { %v591_v3 = vpop.permute.xlu1 %590 }
 0x6ac   :  { %v593_v6 = vmul.f32 %v591_v3, %v585_v5 }
 0x6ae   :  { %595 = vrot.lane.b32.xlu2 %v593_v6, %s2035_s18 }
 0x708   :  { %v596_v8 = vpop.permute.xlu2 %595 }
 0x709   :  { %v598_v9 = vadd.f32 %v596_v8, %v588_v7 }
 0x70b   :  { %1891 = vtanh.f32 %v598_v9 }
 0x711   :  { %v1892_v11 = vpop.eup %1891 }
 0x712   :  { %601 = vrot.lane.b32.xlu0 %v1892_v11, %s2034_s3 }
 0x784   :  { %v602_v12 = vpop.permute.xlu0 %601 }
 0x785   :  { %v604_v13 = vmul.f32 %v602_v12, %v585_v5 }
 0x787   :  { %608 = vrot.lane.b32.xlu1 %v604_v13, %s2035_s18 }
 0x7f9   :  { %v609_v14 = vpop.permute.xlu1 %608 }
 0x7fa   :  { %1817 = vmatmul.msk.f32.vlgmr.msra.gmra.mxu3 %vm413_vm13, %v609_v14 }
 0x7fb   :  { %884 = vmatpush.msra.mxu3 %v2263_v60 }
 0x7fd   :  { %885 = vmatpush.msra.mxu3 %v2271_v62 }
 0x7ff   :  { %886 = vmatpush.msra.mxu3 %v2277_v0 }
 0x801   :  { %887 = vmatpush.msra.mxu3 %v2292_v4 }
 0x87d   :  { %v629_v15 = vpop.f32.mrf.mxu3 }
 0x87e   :  { %v632_v16 = vadd.f32 %v629_v15, %v2370_v21 }
 0x880   :  { %1893 = vtanh.f32 %v632_v16  ;;  %v1818_v20 = vmul.f32 -1.442695, %v632_v16 }
 0x882   :  { %1895 = vpow2.f32 %v1818_v20 }
 0x886   :  { %v1894_v18 = vpop.eup %1893 }
 0x887   :  { %655 = vrot.lane.b32.xlu2 %v1894_v18, %s2034_s3 }
 0x888   :  { %v1896_v22 = vpop.eup %1895 }
 0x889   :  { %v636_v24 = vadd.f32 1.0, %v1896_v22 }
 0x88b   :  { %1897 = vrcp.f32 %v636_v24  ;;  %v648_v0 = vand.u32 2147483648, %v636_v24  ;;  %vm642_vm7 = vweird.f32 %v636_v24  ;;  %v646_v4 = vand.u32 2147483647, %v636_v24 }
 0x88d   :  { %v649_v17 = vor.u32 1.1754944e-38, %v648_v0  ;;  %vm647_vm9 = vcmp.eq.f32.partialorder %v646_v4, 8.507059e+37 }
 0x891   :  { %v1898_v26 = vpop.eup %1897 }
 0x892   :  { %v638_v60 = vmul.f32 %v1898_v26, %v636_v24  ;;  %vm643_vm6 = vweird.f32 %v1898_v26 }
 0x893   :  { %vm644_vm8 = vmor %vm642_vm7, %vm643_vm6 }
 0x894   :  { %v639_v28 = vsub.f32 1.0, %v638_v60 }
 0x896   :  { %v640_v62 = vmul.f32 %v1898_v26, %v639_v28 }
 0x898   :  { %v641_v31 = vadd.f32 %v1898_v26, %v640_v62 }
 0x89a   :  { %v645_v21 = vsel %vm644_vm8, %v1898_v26, %v641_v31 }
 0x89b   :  { %v650_v34 = vsel %vm647_vm9, %v649_v17, %v645_v21 }
 0x89c   :  { %v653_v37 = vmul.f32 %v650_v34, %v598_v9 }
 0x8e1   :  { %v656_v32 = vpop.permute.xlu2 %655 }
 0x8e2   :  { %v658_v35 = vmul.f32 %v656_v32, %v650_v34 }
 0x8e4   :  { %660 = vrot.lane.b32.xlu0 %v658_v35, %s2035_s18 }
 0x956   :  { %v661_v38 = vpop.permute.xlu0 %660 }
 0x957   :  { %v663_v40 = vadd.f32 %v661_v38, %v653_v37 }
 0x959   :  { %1899 = vtanh.f32 %v663_v40 }
 0x95f   :  { %v1900_v42 = vpop.eup %1899 }
 0x960   :  { %666 = vrot.lane.b32.xlu1 %v1900_v42, %s2034_s3 }
 0x9d2   :  { %v667_v44 = vpop.permute.xlu1 %666 }
 0x9d3   :  { %v669_v46 = vmul.f32 %v667_v44, %v650_v34 }
 0x9d5   :  { %673 = vrot.lane.b32.xlu2 %v669_v46, %s2035_s18 }
 0xa2f   :  { %v674_v48 = vpop.permute.xlu2 %673 }
 0xa30   :  { %1819 = vmatmul.msk.f32.vlgmr.msra.gmra.mxu2 %vm413_vm13, %v674_v48 }
 0xab3   :  { %v694_v49 = vpop.f32.mrf.mxu2 }
 0xab4   :  { %v697_v50 = vadd.f32 %v694_v49, %v2372_v23 }
 0xab6   :  { %1901 = vtanh.f32 %v697_v50  ;;  %v1820_v52 = vmul.f32 -1.442695, %v697_v50 }
 0xab8   :  { %1903 = vpow2.f32 %v1820_v52 }
 0xabc   :  { %v1902_v51 = vpop.eup %1901 }
 0xabd   :  { %720 = vrot.lane.b32.xlu0 %v1902_v51, %s2034_s3 }
 0xabe   :  { %v1904_v53 = vpop.eup %1903 }
 0xabf   :  { %v701_v54 = vadd.f32 1.0, %v1904_v53 }
 0xac1   :  { %1905 = vrcp.f32 %v701_v54  ;;  %v713_v61 = vand.u32 2147483648, %v701_v54  ;;  %vm707_vm11 = vweird.f32 %v701_v54  ;;  %v711_v63 = vand.u32 2147483647, %v701_v54 }
 0xac3   :  { %v714_v1 = vor.u32 1.1754944e-38, %v713_v61  ;;  %vm712_vm14 = vcmp.eq.f32.partialorder %v711_v63, 8.507059e+37 }
 0xac7   :  { %v1906_v55 = vpop.eup %1905 }
 0xac8   :  { %v703_v56 = vmul.f32 %v1906_v55, %v701_v54  ;;  %vm708_vm10 = vweird.f32 %v1906_v55 }
 0xac9   :  { %vm709_vm12 = vmor %vm707_vm11, %vm708_vm10  ;;  %vm974_vm11 = vcmask 326656  }
 0xaca   :  { %v704_v57 = vsub.f32 1.0, %v703_v56 }
 0xacc   :  { %v705_v58 = vmul.f32 %v1906_v55, %v704_v57 }
 0xace   :  { %v706_v59 = vadd.f32 %v1906_v55, %v705_v58 }
 0xad0   :  { %v710_v23 = vsel %vm709_vm12, %v1906_v55, %v706_v59 }
 0xad1   :  { %v715_v2 = vsel %vm712_vm14, %v714_v1, %v710_v23 }
 0xad2   :  { %v718_v5 = vmul.f32 %v715_v2, %v663_v40 }
 0xb2f   :  { %v721_v19 = vpop.permute.xlu0 %720 }
 0xb30   :  { %v723_v3 = vmul.f32 %v721_v19, %v715_v2 }
 0xb32   :  { %725 = vrot.lane.b32.xlu1 %v723_v3, %s2035_s18 }
 0xba4   :  { %v726_v6 = vpop.permute.xlu1 %725 }
 0xba5   :  { %v728_v7 = vadd.f32 %v726_v6, %v718_v5 }
 0xba7   :  { %1907 = vtanh.f32 %v728_v7 }
 0xbad   :  { %v1908_v8 = vpop.eup %1907 }
 0xbae   :  { %731 = vrot.lane.b32.xlu2 %v1908_v8, %s2034_s3 }
 0xc08   :  { %v732_v9 = vpop.permute.xlu2 %731 }
 0xc09   :  { %v734_v11 = vmul.f32 %v732_v9, %v715_v2 }
 0xc0b   :  { %738 = vrot.lane.b32.xlu0 %v734_v11, %s2035_s18 }
 0xc7d   :  { %v739_v12 = vpop.permute.xlu0 %738 }
 0xc7e   :  { %1821 = vmatmul.msk.f32.vlgmr.msrb.gmra.mxu3 %vm413_vm13, %v739_v12 }
 0xd01   :  { %v759_v13 = vpop.f32.mrf.mxu3 }
 0xd02   :  { %v762_v14 = vadd.f32 %v759_v13, %v2374_v25 }
 0xd04   :  { %1909 = vtanh.f32 %v762_v14  ;;  %v1822_v16 = vmul.f32 -1.442695, %v762_v14 }
 0xd06   :  { %1911 = vpow2.f32 %v1822_v16 }
 0xd0a   :  { %v1910_v15 = vpop.eup %1909 }
 0xd0b   :  { %785 = vrot.lane.b32.xlu1 %v1910_v15, %s2034_s3 }
 0xd0c   :  { %v1912_v18 = vpop.eup %1911 }
 0xd0d   :  { %v766_v20 = vadd.f32 1.0, %v1912_v18 }
 0xd0f   :  { %1913 = vrcp.f32 %v766_v20  ;;  %v778_v62 = vand.u32 2147483648, %v766_v20  ;;  %vm772_vm0 = vweird.f32 %v766_v20  ;;  %v776_v31 = vand.u32 2147483647, %v766_v20 }
 0xd11   :  { %v779_v0 = vor.u32 1.1754944e-38, %v778_v62  ;;  %vm777_vm2 = vcmp.eq.f32.partialorder %v776_v31, 8.507059e+37 }
 0xd15   :  { %v1914_v22 = vpop.eup %1913 }
 0xd16   :  { %v768_v24 = vmul.f32 %v1914_v22, %v766_v20  ;;  %vm773_vm15 = vweird.f32 %v1914_v22 }
 0xd17   :  { %vm774_vm1 = vmor %vm772_vm0, %vm773_vm15 }
 0xd18   :  { %v769_v26 = vsub.f32 1.0, %v768_v24 }
 0xd1a   :  { %v770_v60 = vmul.f32 %v1914_v22, %v769_v26 }
 0xd1c   :  { %v771_v28 = vadd.f32 %v1914_v22, %v770_v60 }
 0xd1e   :  { %v775_v25 = vsel %vm774_vm1, %v1914_v22, %v771_v28 }
 0xd1f   :  { %v780_v21 = vsel %vm777_vm2, %v779_v0, %v775_v25 }
 0xd20   :  { %v783_v32 = vmul.f32 %v780_v21, %v728_v7 }
 0xd7d   :  { %v786_v4 = vpop.permute.xlu1 %785 }
 0xd7e   :  { %v788_v17 = vmul.f32 %v786_v4, %v780_v21 }
 0xd80   :  { %790 = vrot.lane.b32.xlu2 %v788_v17, %s2035_s18  ;;  %v933_v17 = vld [vmem:[%s2641_s6 + $0x18] sm:$0xff] }
 0xd81   :  { %955 = vmatpush.msra.mxu2 %v933_v17 }
 0xdda   :  { %v791_v34 = vpop.permute.xlu2 %790 }
 0xddb   :  { %v793_v35 = vadd.f32 %v791_v34, %v783_v32  ;;  %v932_v32 = vld [vmem:[%s2641_s6 + $0x10] sm:$0xff]  ;;  %v931_v34 = vld [vmem:[%s2641_s6 + $0x8] sm:$0xff] }
 0xddc   :  { %956 = vmatpush.msra.mxu2 %v932_v32 }
 0xddd   :  { %1915 = vtanh.f32 %v793_v35 }
 0xdde   :  { %957 = vmatpush.msra.mxu2 %v931_v34 }
 0xde3   :  { %v1916_v37 = vpop.eup %1915 }
 0xde4   :  { %796 = vrot.lane.b32.xlu0 %v1916_v37, %s2034_s3 }
 0xe56   :  { %v797_v38 = vpop.permute.xlu0 %796 }
 0xe57   :  { %v799_v40 = vmul.f32 %v797_v38, %v780_v21 }
 0xe59   :  { %803 = vrot.lane.b32.xlu1 %v799_v40, %s2035_s18 }
 0xecb   :  { %v804_v42 = vpop.permute.xlu1 %803 }
 0xecc   :  { %1823 = vmatmul.msk.f32.vlgmr.msrb.gmra.mxu2 %vm413_vm13, %v804_v42  ;;  %v980_v42 = vld [vmem:[%s2643_s9 + $0x20] sm:$0xff] }
 0xecd   :  { %999 = vmatpush.msrb.mxu3 %v980_v42 }
 0xf4f   :  { %v824_v44 = vpop.f32.mrf.mxu2 }
 0xf50   :  { %v827_v46 = vadd.f32 %v824_v44, %v2376_v27  ;;  %v979_v44 = vld [vmem:[%s2643_s9 + $0x18] sm:$0xff] }
 0xf51   :  { %1000 = vmatpush.msrb.mxu3 %v979_v44 }
 0xf52   :  { %1917 = vtanh.f32 %v827_v46  ;;  %v1824_v49 = vmul.f32 -1.442695, %v827_v46  ;;  %v978_v46 = vld [vmem:[%s2643_s9 + $0x10] sm:$0xff] }
 0xf53   :  { %1001 = vmatpush.msrb.mxu3 %v978_v46 }
 0xf54   :  { %1919 = vpow2.f32 %v1824_v49 }
 0xf58   :  { %v1918_v48 = vpop.eup %1917 }
 0xf59   :  { %850 = vrot.lane.b32.xlu2 %v1918_v48, %s2034_s3  ;;  %v1866_v48 = vld [vmem:[%s2642_s7] ss:$0 sm:$0xff] }
 0xf5a   :  { %v1920_v50 = vpop.eup %1919 }
 0xf5b   :  { %v831_v51 = vadd.f32 1.0, %v1920_v50 }
 0xf5d   :  { %1921 = vrcp.f32 %v831_v51  ;;  %v843_v57 = vand.u32 2147483648, %v831_v51  ;;  %vm837_vm4 = vweird.f32 %v831_v51  ;;  %v841_v58 = vand.u32 2147483647, %v831_v51 }
 0xf5f   :  { %v844_v59 = vor.u32 1.1754944e-38, %v843_v57  ;;  %vm842_vm6 = vcmp.eq.f32.partialorder %v841_v58, 8.507059e+37  ;;  %v1011_v57 = vld [vmem:[%s2646_s5 + $0x10] sm:$0xff]  ;;  %v964_v58 = vld [vmem:[%s2647_s8] sm:$0xff] }
 0xf63   :  { %v1922_v52 = vpop.eup %1921 }
 0xf64   :  { %v833_v53 = vmul.f32 %v1922_v52, %v831_v51  ;;  %vm838_vm3 = vweird.f32 %v1922_v52 }
 0xf65   :  { %vm839_vm5 = vmor %vm837_vm4, %vm838_vm3 }
 0xf66   :  { %v834_v54 = vsub.f32 1.0, %v833_v53 }
 0xf68   :  { %v835_v55 = vmul.f32 %v1922_v52, %v834_v54  ;;  %v977_v54 = vld [vmem:[%s2643_s9 + $0x8] sm:$0xff] }
 0xf69   :  { %1002 = vmatpush.msrb.mxu3 %v977_v54 }
 0xf6a   :  { %v836_v56 = vadd.f32 %v1922_v52, %v835_v55  ;;  %v976_v55 = vld [vmem:[%s2643_s9] sm:$0xff] }
 0xf6b   :  { %1003 = vmatpush.msrb.mxu3 %v976_v55 }
 0xf6c   :  { %v840_v27 = vsel %vm839_vm5, %v1922_v52, %v836_v56  ;;  %v1012_v56 = vld [vmem:[%s2646_s5 + $0x18] sm:$0xff] }
 0xf6d   :  { %v845_v63 = vsel %vm842_vm6, %v844_v59, %v840_v27  ;;  %1099 = vmatpush.msra.mxu1 %v1012_v56  ;;  %1315 = vmatpush.msrb.mxu0 %v1012_v56 }
 0xf6e   :  { %v848_v1 = vmul.f32 %v845_v63, %v793_v35  ;;  %v930_v35 = vld [vmem:[%s2641_s6] sm:$0xff] }
 0xf6f   :  { %958 = vmatpush.msra.mxu2 %v930_v35  ;;  %1100 = vmatpush.msra.mxu1 %v1011_v57 }
 0xf70   :  { %1316 = vmatpush.msrb.mxu0 %v1011_v57 }
 0xf71   :  { %1171 = vmatpush.msrb.mxu2 %v1012_v56 }
 0xf73   :  { %1172 = vmatpush.msrb.mxu2 %v1011_v57 }
 0xfb3   :  { %v851_v61 = vpop.permute.xlu2 %850 }
 0xfb4   :  { %v853_v23 = vmul.f32 %v851_v61, %v845_v63 }
 0xfb6   :  { %855 = vrot.lane.b32.xlu0 %v853_v23, %s2035_s18  ;;  %v1009_v23 = vld [vmem:[%s2646_s5] sm:$0xff] }
0x1028   :  { %v856_v19 = vpop.permute.xlu0 %855 }
0x1029   :  { %v858_v2 = vadd.f32 %v856_v19, %v848_v1  ;;  %v1867_v1 = vld [vmem:[%s2645_s10] ss:$0 sm:$0xff] }
0x102b   :  { %1923 = vtanh.f32 %v858_v2 }
0x1031   :  { %v1924_v3 = vpop.eup %1923 }
0x1032   :  { %861 = vrot.lane.b32.xlu1 %v1924_v3, %s2034_s3  ;;  %v369_v3 = vadd.f32 %v2380_v30, %v2382_v33 }
0x10a4   :  { %v862_v5 = vpop.permute.xlu1 %861 }
0x10a5   :  { %v864_v6 = vmul.f32 %v862_v5, %v845_v63  ;;  %v1010_v63 = vld [vmem:[%s2646_s5 + $0x8] sm:$0xff] }
0x10a6   :  { %1101 = vmatpush.msra.mxu1 %v1010_v63  ;;  %1173 = vmatpush.msrb.mxu2 %v1010_v63 }
0x10a7   :  { %868 = vrot.lane.b32.xlu2 %v864_v6, %s2035_s18  ;;  %1317 = vmatpush.msrb.mxu0 %v1010_v63 }
0x10a8   :  { %1102 = vmatpush.msra.mxu1 %v1009_v23  ;;  %1174 = vmatpush.msrb.mxu2 %v1009_v23 }
0x10a9   :  { %1318 = vmatpush.msrb.mxu0 %v1009_v23 }
0x10aa   :  { %1387 = vmatpush.msrb.mxu1 %v1012_v56 }
0x10ac   :  { %1388 = vmatpush.msrb.mxu1 %v1011_v57 }
0x10ae   :  { %1389 = vmatpush.msrb.mxu1 %v1010_v63 }
0x10b0   :  { %1390 = vmatpush.msrb.mxu1 %v1009_v23 }
0x1101   :  { %v869_v7 = vpop.permute.xlu2 %868 }
0x1102   :  { %1825 = vmatmul.msk.f32.vlgmr.msra.gmra.mxu3 %vm413_vm13, %v869_v7 }
0x1103   :  { %1028 = vmatpush.msra.mxu3 %v1012_v56 }
0x1105   :  { %1029 = vmatpush.msra.mxu3 %v1011_v57 }
0x1107   :  { %1030 = vmatpush.msra.mxu3 %v1010_v63 }
0x1109   :  { %1031 = vmatpush.msra.mxu3 %v1009_v23 }
0x1185   :  { %v889_v8 = vpop.f32.mrf.mxu3 }
0x1186   :  { %v892_v9 = vadd.f32 %v889_v8, %v2378_v29 }
0x1188   :  { %1925 = vtanh.f32 %v892_v9  ;;  %v1826_v12 = vmul.f32 -1.442695, %v892_v9 }
0x118a   :  { %1927 = vpow2.f32 %v1826_v12 }
0x118e   :  { %v1926_v11 = vpop.eup %1925 }
0x118f   :  { %915 = vrot.lane.b32.xlu0 %v1926_v11, %s2034_s3 }
0x1190   :  { %v1928_v13 = vpop.eup %1927 }
0x1191   :  { %v896_v14 = vadd.f32 1.0, %v1928_v13 }
0x1193   :  { %1929 = vrcp.f32 %v896_v14  ;;  %v908_v24 = vand.u32 2147483648, %v896_v14  ;;  %vm902_vm8 = vweird.f32 %v896_v14  ;;  %v906_v26 = vand.u32 2147483647, %v896_v14 }
0x1195   :  { %v909_v60 = vor.u32 1.1754944e-38, %v908_v24  ;;  %vm907_vm10 = vcmp.eq.f32.partialorder %v906_v26, 8.507059e+37 }
0x1199   :  { %v1930_v15 = vpop.eup %1929 }
0x119a   :  { %v898_v16 = vmul.f32 %v1930_v15, %v896_v14  ;;  %vm903_vm7 = vweird.f32 %v1930_v15 }
0x119b   :  { %vm904_vm9 = vmor %vm902_vm8, %vm903_vm7 }
0x119c   :  { %v899_v18 = vsub.f32 1.0, %v898_v16 }
0x119e   :  { %v900_v20 = vmul.f32 %v1930_v15, %v899_v18 }
0x11a0   :  { %v901_v22 = vadd.f32 %v1930_v15, %v900_v20 }
0x11a2   :  { %v905_v29 = vsel %vm904_vm9, %v1930_v15, %v901_v22 }
0x11a3   :  { %v910_v62 = vsel %vm907_vm10, %v909_v60, %v905_v29 }
0x11a4   :  { %v913_v25 = vmul.f32 %v910_v62, %v858_v2 }
0x1201   :  { %v916_v28 = vpop.permute.xlu0 %915 }
0x1202   :  { %v918_v31 = vmul.f32 %v916_v28, %v910_v62 }
0x1204   :  { %920 = vrot.lane.b32.xlu1 %v918_v31, %s2035_s18 }
0x1276   :  { %v921_v0 = vpop.permute.xlu1 %920 }
0x1277   :  { %v923_v4 = vadd.f32 %v921_v0, %v913_v25 }
0x1279   :  { %1931 = vtanh.f32 %v923_v4 }
0x127f   :  { %v1932_v21 = vpop.eup %1931 }
0x1280   :  { %926 = vrot.lane.b32.xlu2 %v1932_v21, %s2034_s3 }
0x12da   :  { %v927_v37 = vpop.permute.xlu2 %926 }
0x12db   :  { %v929_v38 = vmul.f32 %v927_v37, %v910_v62 }
0x12dd   :  { %939 = vrot.lane.b32.xlu0 %v929_v38, %s2035_s18 }
0x134f   :  { %v940_v40 = vpop.permute.xlu0 %939 }
0x1350   :  { %1827 = vmatmul.msk.f32.vlgmr.msra.gmra.mxu2 %vm413_vm13, %v940_v40 }
0x1351   :  { %1459 = vmatpush.msra.mxu2 %v1012_v56 }
0x1353   :  { %1460 = vmatpush.msra.mxu2 %v1011_v57 }
0x1355   :  { %1461 = vmatpush.msra.mxu2 %v1010_v63 }
0x1357   :  { %1462 = vmatpush.msra.mxu2 %v1009_v23 }
0x13d3   :  { %v960_v49 = vpop.f32.mrf.mxu2 }
0x13d4   :  { %v961_v50 = vadd.f32 %v1866_v48, %v960_v49 }
0x13d6   :  { %963 = vst [vmem:[%s2644_s14] sm:$0xff] %v961_v50  ;;  %v965_v51 = vmul.f32 0.5, %v961_v50 }
0x13d8   :  { %v966_v52 = vmul.f32 1.442695, %v965_v51 }
0x13da   :  { %1933 = vpow2.f32 %v966_v52 }
0x13e0   :  { %v1934_v53 = vpop.eup %1933 }
0x13e1   :  { %969 = vrot.lane.b32.xlu1 %v1934_v53, %s2036_s17 }
0x1453   :  { %v970_v27 = vpop.permute.xlu1 %969 }
0x1454   :  { %v972_v59 = vmul.f32 %v970_v27, %v964_v58 }
0x1456   :  { %v973_v61 = vadd.f32 %v972_v59, %v961_v50 }
0x1458   :  { %975 = vst.msk [vmem:[%s2648_s15] sm:$0xff] %vm974_vm11, %v973_v61  ;;  %1828 = vmatmul.msk.f32.vlgmr.msrb.gmra.mxu3 %vm974_vm11, %v973_v61 }
0x1459   :  { %1243 = vmatpush.msrb.mxu3 %v1012_v56 }
0x145b   :  { %1244 = vmatpush.msrb.mxu3 %v1011_v57 }
0x145d   :  { %1245 = vmatpush.msrb.mxu3 %v1010_v63 }
0x145f   :  { %1246 = vmatpush.msrb.mxu3 %v1009_v23 }
0x14db   :  { %v1005_v19 = vpop.f32.mrf.mxu3 }
0x14dc   :  { %v1006_v2 = vadd.f32 %v1867_v1, %v1005_v19 }
0x14de   :  { %1829 = vmatmul.msk.f32.vlgmr.msra.gmra.mxu3 %vm413_vm13, %v1006_v2 }
0x14df   :  { %1531 = vmatpush.msra.mxu3 %v1012_v56 }
0x14e1   :  { %1532 = vmatpush.msra.mxu3 %v1011_v57 }
0x14e3   :  { %1533 = vmatpush.msra.mxu3 %v1010_v63 }
0x14e5   :  { %1534 = vmatpush.msra.mxu3 %v1009_v23 }
0x1561   :  { %v1033_v5 = vpop.f32.mrf.mxu3 }
0x1562   :  { %v1036_v6 = vadd.f32 %v1033_v5, %v369_v3 }
0x1564   :  { %1935 = vtanh.f32 %v1036_v6  ;;  %v1830_v8 = vmul.f32 -1.442695, %v1036_v6 }
0x1566   :  { %1937 = vpow2.f32 %v1830_v8 }
0x156a   :  { %v1936_v7 = vpop.eup %1935 }
0x156b   :  { %1059 = vrot.lane.b32.xlu2 %v1936_v7, %s2034_s3 }
0x156c   :  { %v1938_v9 = vpop.eup %1937 }
0x156d   :  { %v1040_v11 = vadd.f32 1.0, %v1938_v9 }
0x156f   :  { %1939 = vrcp.f32 %v1040_v11  ;;  %v1052_v18 = vand.u32 2147483648, %v1040_v11  ;;  %vm1046_vm14 = vweird.f32 %v1040_v11  ;;  %v1050_v30 = vand.u32 2147483647, %v1040_v11 }
0x1571   :  { %v1053_v22 = vor.u32 1.1754944e-38, %v1052_v18  ;;  %vm1051_vm0 = vcmp.eq.f32.partialorder %v1050_v30, 8.507059e+37 }
0x1575   :  { %v1940_v12 = vpop.eup %1939 }
0x1576   :  { %v1042_v13 = vmul.f32 %v1940_v12, %v1040_v11  ;;  %vm1047_vm12 = vweird.f32 %v1940_v12 }
0x1577   :  { %vm1048_vm15 = vmor %vm1046_vm14, %vm1047_vm12 }
0x1578   :  { %v1043_v14 = vsub.f32 1.0, %v1042_v13 }
0x157a   :  { %v1044_v15 = vmul.f32 %v1940_v12, %v1043_v14 }
0x157c   :  { %v1045_v16 = vadd.f32 %v1940_v12, %v1044_v15 }
0x157e   :  { %v1049_v20 = vsel %vm1048_vm15, %v1940_v12, %v1045_v16 }
0x157f   :  { %v1054_v26 = vsel %vm1051_vm0, %v1053_v22, %v1049_v20 }
0x1580   :  { %v1057_v60 = vmul.f32 0.0, %v1054_v26 }
0x15c5   :  { %v1060_v24 = vpop.permute.xlu2 %1059 }
0x15c6   :  { %v1062_v29 = vmul.f32 %v1060_v24, %v1054_v26 }
0x15c8   :  { %1064 = vrot.lane.b32.xlu0 %v1062_v29, %s2035_s18 }
0x163a   :  { %v1065_v28 = vpop.permute.xlu0 %1064 }
0x163b   :  { %v1067_v62 = vadd.f32 %v1065_v28, %v1057_v60 }
0x163d   :  { %1941 = vtanh.f32 %v1067_v62 }
0x1643   :  { %v1942_v31 = vpop.eup %1941 }
0x1644   :  { %1070 = vrot.lane.b32.xlu1 %v1942_v31, %s2034_s3 }
0x16b6   :  { %v1071_v25 = vpop.permute.xlu1 %1070 }
0x16b7   :  { %v1073_v0 = vmul.f32 %v1071_v25, %v1054_v26 }
0x16b9   :  { %1075 = vrot.lane.b32.xlu2 %v1073_v0, %s2035_s18 }
0x1713   :  { %v1076_v4 = vpop.permute.xlu2 %1075 }
0x1714   :  { %1078 = vst.msk [vmem:[#allocation4] sm:$0xff] %vm413_vm13, %v1076_v4  ;;  %1831 = vmatmul.msk.f32.vlgmr.msra.gmra.mxu1 %vm413_vm13, %v1076_v4 }
0x1791   :  { %v1104_v21 = vpop.f32.mrf.mxu1 }
0x1792   :  { %v1107_v17 = vadd.f32 %v1104_v21, %v2385_v36 }
0x1794   :  { %1943 = vtanh.f32 %v1107_v17  ;;  %v1832_v34 = vmul.f32 -1.442695, %v1107_v17 }
0x1796   :  { %1945 = vpow2.f32 %v1832_v34 }
0x179a   :  { %v1944_v32 = vpop.eup %1943 }
0x179b   :  { %1130 = vrot.lane.b32.xlu0 %v1944_v32, %s2034_s3 }
0x179c   :  { %v1946_v35 = vpop.eup %1945 }
0x179d   :  { %v1111_v37 = vadd.f32 1.0, %v1946_v35 }
0x179f   :  { %1947 = vrcp.f32 %v1111_v37  ;;  %v1123_v48 = vand.u32 2147483648, %v1111_v37  ;;  %vm1117_vm2 = vweird.f32 %v1111_v37  ;;  %v1121_v49 = vand.u32 2147483647, %v1111_v37 }
0x17a1   :  { %v1124_v50 = vor.u32 1.1754944e-38, %v1123_v48  ;;  %vm1122_vm4 = vcmp.eq.f32.partialorder %v1121_v49, 8.507059e+37 }
0x17a5   :  { %v1948_v38 = vpop.eup %1947 }
0x17a6   :  { %v1113_v40 = vmul.f32 %v1948_v38, %v1111_v37  ;;  %vm1118_vm1 = vweird.f32 %v1948_v38 }
0x17a7   :  { %vm1119_vm3 = vmor %vm1117_vm2, %vm1118_vm1 }
0x17a8   :  { %v1114_v42 = vsub.f32 1.0, %v1113_v40 }
0x17aa   :  { %v1115_v44 = vmul.f32 %v1948_v38, %v1114_v42 }
0x17ac   :  { %v1116_v46 = vadd.f32 %v1948_v38, %v1115_v44 }
0x17ae   :  { %v1120_v36 = vsel %vm1119_vm3, %v1948_v38, %v1116_v46 }
0x17af   :  { %v1125_v52 = vsel %vm1122_vm4, %v1124_v50, %v1120_v36 }
0x17b0   :  { %v1128_v54 = vmul.f32 %v1125_v52, %v1067_v62 }
0x180d   :  { %v1131_v51 = vpop.permute.xlu0 %1130 }
0x180e   :  { %v1133_v53 = vmul.f32 %v1131_v51, %v1125_v52  ;;  %v1594_v51 = vld [vmem:[%s2649_s11 + $0x18] sm:$0xff] }
0x180f   :  { %1635 = vmatpush.msra.mxu0 %v1594_v51 }
0x1810   :  { %1135 = vrot.lane.b32.xlu1 %v1133_v53, %s2035_s18  ;;  %v1592_v53 = vld [vmem:[%s2649_s11 + $0x8] sm:$0xff] }
0x1882   :  { %v1136_v55 = vpop.permute.xlu1 %1135 }
0x1883   :  { %v1138_v56 = vadd.f32 %v1136_v55, %v1128_v54  ;;  %v1591_v54 = vld [vmem:[%s2649_s11] sm:$0xff] }
0x1885   :  { %1949 = vtanh.f32 %v1138_v56 }
0x188b   :  { %v1950_v57 = vpop.eup %1949 }
0x188c   :  { %1141 = vrot.lane.b32.xlu2 %v1950_v57, %s2034_s3 }
0x18e6   :  { %v1142_v58 = vpop.permute.xlu2 %1141 }
0x18e7   :  { %v1144_v27 = vmul.f32 %v1142_v58, %v1125_v52  ;;  %v1593_v52 = vld [vmem:[%s2649_s11 + $0x10] sm:$0xff] }
0x18e8   :  { %1636 = vmatpush.msra.mxu0 %v1593_v52 }
0x18e9   :  { %1146 = vrot.lane.b32.xlu0 %v1144_v27, %s2035_s18 }
0x18ea   :  { %1637 = vmatpush.msra.mxu0 %v1592_v53 }
0x18ec   :  { %1638 = vmatpush.msra.mxu0 %v1591_v54 }
0x195b   :  { %v1147_v59 = vpop.permute.xlu0 %1146 }
0x195c   :  { %1150 = vst.msk [vmem:[#allocation4 + $0x8] sm:$0xff] %vm413_vm13, %v1147_v59  ;;  %1833 = vmatmul.msk.f32.vlgmr.msrb.gmra.mxu2 %vm413_vm13, %v1147_v59 }
0x1963   :  { %v1584_v57 = vld [vmem:[#allocation4 + $0x8] sm:$0xff] }
0x19df   :  { %v1176_v61 = vpop.f32.mrf.mxu2 }
0x19e0   :  { %v1179_v63 = vadd.f32 %v1176_v61, %v2389_v39 }
0x19e2   :  { %1951 = vtanh.f32 %v1179_v63  ;;  %v1834_v1 = vmul.f32 -1.442695, %v1179_v63 }
0x19e4   :  { %1953 = vpow2.f32 %v1834_v1 }
0x19e8   :  { %v1952_v23 = vpop.eup %1951 }
0x19e9   :  { %1202 = vrot.lane.b32.xlu1 %v1952_v23, %s2034_s3 }
0x19ea   :  { %v1954_v19 = vpop.eup %1953 }
0x19eb   :  { %v1183_v2 = vadd.f32 1.0, %v1954_v19 }
0x19ed   :  { %1955 = vrcp.f32 %v1183_v2  ;;  %v1195_v9 = vand.u32 2147483648, %v1183_v2  ;;  %vm1189_vm6 = vweird.f32 %v1183_v2  ;;  %v1193_v11 = vand.u32 2147483647, %v1183_v2 }
0x19ef   :  { %v1196_v12 = vor.u32 1.1754944e-38, %v1195_v9  ;;  %vm1194_vm8 = vcmp.eq.f32.partialorder %v1193_v11, 8.507059e+37 }
0x19f3   :  { %v1956_v3 = vpop.eup %1955 }
0x19f4   :  { %v1185_v5 = vmul.f32 %v1956_v3, %v1183_v2  ;;  %vm1190_vm5 = vweird.f32 %v1956_v3 }
0x19f5   :  { %vm1191_vm7 = vmor %vm1189_vm6, %vm1190_vm5 }
0x19f6   :  { %v1186_v6 = vsub.f32 1.0, %v1185_v5 }
0x19f8   :  { %v1187_v7 = vmul.f32 %v1956_v3, %v1186_v6 }
0x19fa   :  { %v1188_v8 = vadd.f32 %v1956_v3, %v1187_v7 }
0x19fc   :  { %v1192_v39 = vsel %vm1191_vm7, %v1956_v3, %v1188_v8 }
0x19fd   :  { %v1197_v14 = vsel %vm1194_vm8, %v1196_v12, %v1192_v39 }
0x19fe   :  { %v1200_v16 = vmul.f32 %v1197_v14, %v1138_v56  ;;  %v1583_v56 = vld [vmem:[#allocation4] sm:$0xff] }
0x1a5b   :  { %v1203_v13 = vpop.permute.xlu1 %1202 }
0x1a5c   :  { %v1205_v15 = vmul.f32 %v1203_v13, %v1197_v14 }
0x1a5e   :  { %1207 = vrot.lane.b32.xlu2 %v1205_v15, %s2035_s18 }
0x1ab8   :  { %v1208_v18 = vpop.permute.xlu2 %1207 }
0x1ab9   :  { %v1210_v30 = vadd.f32 %v1208_v18, %v1200_v16 }
0x1abb   :  { %1957 = vtanh.f32 %v1210_v30 }
0x1ac1   :  { %v1958_v20 = vpop.eup %1957 }
0x1ac2   :  { %1213 = vrot.lane.b32.xlu0 %v1958_v20, %s2034_s3 }
0x1b34   :  { %v1214_v22 = vpop.permute.xlu0 %1213 }
0x1b35   :  { %v1216_v24 = vmul.f32 %v1214_v22, %v1197_v14 }
0x1b37   :  { %1218 = vrot.lane.b32.xlu1 %v1216_v24, %s2035_s18 }
0x1ba9   :  { %v1219_v26 = vpop.permute.xlu1 %1218 }
0x1baa   :  { %1222 = vst.msk [vmem:[#allocation4 + $0x10] sm:$0xff] %vm413_vm13, %v1219_v26  ;;  %1835 = vmatmul.msk.f32.vlgmr.msrb.gmra.mxu3 %vm413_vm13, %v1219_v26 }
0x1bb1   :  { %v1585_v58 = vld [vmem:[#allocation4 + $0x10] sm:$0xff] }
0x1c2d   :  { %v1248_v29 = vpop.f32.mrf.mxu3 }
0x1c2e   :  { %v1251_v60 = vadd.f32 %v1248_v29, %v2392_v41 }
0x1c30   :  { %1959 = vtanh.f32 %v1251_v60  ;;  %v1836_v62 = vmul.f32 -1.442695, %v1251_v60 }
0x1c32   :  { %1961 = vpow2.f32 %v1836_v62 }
0x1c36   :  { %v1960_v28 = vpop.eup %1959 }
0x1c37   :  { %1274 = vrot.lane.b32.xlu2 %v1960_v28, %s2034_s3 }
0x1c38   :  { %v1962_v31 = vpop.eup %1961 }
0x1c39   :  { %v1255_v25 = vadd.f32 1.0, %v1962_v31 }
0x1c3b   :  { %1963 = vrcp.f32 %v1255_v25  ;;  %v1267_v34 = vand.u32 2147483648, %v1255_v25  ;;  %vm1261_vm10 = vweird.f32 %v1255_v25  ;;  %v1265_v35 = vand.u32 2147483647, %v1255_v25 }
0x1c3d   :  { %v1268_v37 = vor.u32 1.1754944e-38, %v1267_v34  ;;  %vm1266_vm12 = vcmp.eq.f32.partialorder %v1265_v35, 8.507059e+37 }
0x1c41   :  { %v1964_v0 = vpop.eup %1963 }
0x1c42   :  { %v1257_v4 = vmul.f32 %v1964_v0, %v1255_v25  ;;  %vm1262_vm9 = vweird.f32 %v1964_v0 }
0x1c43   :  { %vm1263_vm11 = vmor %vm1261_vm10, %vm1262_vm9 }
0x1c44   :  { %v1258_v21 = vsub.f32 1.0, %v1257_v4 }
0x1c46   :  { %v1259_v17 = vmul.f32 %v1964_v0, %v1258_v21 }
0x1c48   :  { %v1260_v32 = vadd.f32 %v1964_v0, %v1259_v17 }
0x1c4a   :  { %v1264_v41 = vsel %vm1263_vm11, %v1964_v0, %v1260_v32 }
0x1c4b   :  { %v1269_v40 = vsel %vm1266_vm12, %v1268_v37, %v1264_v41 }
0x1c4c   :  { %v1272_v44 = vmul.f32 %v1269_v40, %v1210_v30 }
0x1c91   :  { %v1275_v38 = vpop.permute.xlu2 %1274 }
0x1c92   :  { %v1277_v42 = vmul.f32 %v1275_v38, %v1269_v40 }
0x1c94   :  { %1279 = vrot.lane.b32.xlu0 %v1277_v42, %s2035_s18 }
0x1d06   :  { %v1280_v46 = vpop.permute.xlu0 %1279 }
0x1d07   :  { %v1282_v48 = vadd.f32 %v1280_v46, %v1272_v44 }
0x1d09   :  { %1965 = vtanh.f32 %v1282_v48 }
0x1d0f   :  { %v1966_v49 = vpop.eup %1965 }
0x1d10   :  { %1285 = vrot.lane.b32.xlu1 %v1966_v49, %s2034_s3 }
0x1d82   :  { %v1286_v36 = vpop.permute.xlu1 %1285 }
0x1d83   :  { %v1288_v50 = vmul.f32 %v1286_v36, %v1269_v40 }
0x1d85   :  { %1290 = vrot.lane.b32.xlu2 %v1288_v50, %s2035_s18 }
0x1ddf   :  { %v1291_v55 = vpop.permute.xlu2 %1290 }
0x1de0   :  { %1294 = vst.msk [vmem:[#allocation4 + $0x18] sm:$0xff] %vm413_vm13, %v1291_v55  ;;  %1837 = vmatmul.msk.f32.vlgmr.msrb.gmra.mxu0 %vm413_vm13, %v1291_v55 }
0x1de7   :  { %v1586_v27 = vld [vmem:[#allocation4 + $0x18] sm:$0xff] }
0x1de8   :  { %1845 = vmatmul.msk.f32.vlgmr.msra.gmra.mxu0 %vm413_vm13, %v1583_v56 }
0x1df0   :  { %1846 = vmatmul.msk.f32.gmra.mxu0 %vm413_vm13, %v1584_v57 }
0x1df8   :  { %1847 = vmatmul.msk.f32.gmra.mxu0 %vm413_vm13, %v1585_v58 }
0x1e00   :  { %1848 = vmatmul.msk.f32.gmra.mxu0 %vm413_vm13, %v1586_v27 }
0x1e5d   :  { %v1320_v59 = vpop.f32.mrf.mxu0 }
0x1e5e   :  { %v1323_v61 = vadd.f32 %v1320_v59, %v2395_v43 }
0x1e60   :  { %1967 = vtanh.f32 %v1323_v61  ;;  %v1838_v23 = vmul.f32 -1.442695, %v1323_v61 }
0x1e62   :  { %1969 = vpow2.f32 %v1838_v23 }
0x1e66   :  { %v1968_v63 = vpop.eup %1967 }
0x1e67   :  { %1346 = vrot.lane.b32.xlu0 %v1968_v63, %s2034_s3 }
0x1e68   :  { %v1970_v1 = vpop.eup %1969 }
0x1e69   :  { %v1327_v19 = vadd.f32 1.0, %v1970_v1 }
0x1e6b   :  { %1971 = vrcp.f32 %v1327_v19  ;;  %v1339_v8 = vand.u32 2147483648, %v1327_v19  ;;  %vm1333_vm15 = vweird.f32 %v1327_v19  ;;  %v1337_v9 = vand.u32 2147483647, %v1327_v19 }
0x1e6d   :  { %v1340_v11 = vor.u32 1.1754944e-38, %v1339_v8  ;;  %vm1338_vm1 = vcmp.eq.f32.partialorder %v1337_v9, 8.507059e+37 }
0x1e71   :  { %v1972_v2 = vpop.eup %1971 }
0x1e72   :  { %v1329_v3 = vmul.f32 %v1972_v2, %v1327_v19  ;;  %vm1334_vm14 = vweird.f32 %v1972_v2 }
0x1e73   :  { %vm1335_vm0 = vmor %vm1333_vm15, %vm1334_vm14 }
0x1e74   :  { %v1330_v5 = vsub.f32 1.0, %v1329_v3 }
0x1e76   :  { %v1331_v6 = vmul.f32 %v1972_v2, %v1330_v5 }
0x1e78   :  { %v1332_v7 = vadd.f32 %v1972_v2, %v1331_v6 }
0x1e7a   :  { %v1336_v43 = vsel %vm1335_vm0, %v1972_v2, %v1332_v7 }
0x1e7b   :  { %v1341_v12 = vsel %vm1338_vm1, %v1340_v11, %v1336_v43 }
0x1e7c   :  { %v1344_v14 = vmul.f32 %v1341_v12, %v1282_v48 }
0x1ed9   :  { %v1347_v39 = vpop.permute.xlu0 %1346 }
0x1eda   :  { %v1349_v13 = vmul.f32 %v1347_v39, %v1341_v12 }
0x1edc   :  { %1351 = vrot.lane.b32.xlu1 %v1349_v13, %s2035_s18 }
0x1f4e   :  { %v1352_v15 = vpop.permute.xlu1 %1351 }
0x1f4f   :  { %v1354_v16 = vadd.f32 %v1352_v15, %v1344_v14 }
0x1f51   :  { %1973 = vtanh.f32 %v1354_v16 }
0x1f57   :  { %v1974_v18 = vpop.eup %1973 }
0x1f58   :  { %1357 = vrot.lane.b32.xlu2 %v1974_v18, %s2034_s3 }
0x1fb2   :  { %v1358_v30 = vpop.permute.xlu2 %1357 }
0x1fb3   :  { %v1360_v20 = vmul.f32 %v1358_v30, %v1341_v12  ;;  %v390_v12 = vadd.f32 %v2411_v10, %v2382_v33 }
0x1fb5   :  { %1362 = vrot.lane.b32.xlu0 %v1360_v20, %s2035_s18 }
0x2027   :  { %v1363_v22 = vpop.permute.xlu0 %1362 }
0x2028   :  { %1366 = vst.msk [vmem:[#allocation4 + $0x20] sm:$0xff] %vm413_vm13, %v1363_v22  ;;  %1839 = vmatmul.msk.f32.vlgmr.msrb.gmra.mxu1 %vm413_vm13, %v1363_v22 }
0x202f   :  { %v1587_v24 = vld [vmem:[#allocation4 + $0x20] sm:$0xff] }
0x2030   :  { %1849 = vmatmul.msk.f32.gmra.mxu0 %vm413_vm13, %v1587_v24 }
0x20a5   :  { %v1392_v26 = vpop.f32.mrf.mxu1 }
0x20a6   :  { %v1395_v29 = vadd.f32 %v1392_v26, %v2398_v45 }
0x20a8   :  { %1975 = vtanh.f32 %v1395_v29  ;;  %v1840_v28 = vmul.f32 -1.442695, %v1395_v29 }
0x20aa   :  { %1977 = vpow2.f32 %v1840_v28 }
0x20ae   :  { %v1976_v60 = vpop.eup %1975 }
0x20af   :  { %1418 = vrot.lane.b32.xlu1 %v1976_v60, %s2034_s3 }
0x20b0   :  { %v1978_v62 = vpop.eup %1977 }
0x20b1   :  { %v1399_v31 = vadd.f32 1.0, %v1978_v62 }
0x20b3   :  { %1979 = vrcp.f32 %v1399_v31  ;;  %v1411_v32 = vand.u32 2147483648, %v1399_v31  ;;  %vm1405_vm3 = vweird.f32 %v1399_v31  ;;  %v1409_v34 = vand.u32 2147483647, %v1399_v31 }
0x20b5   :  { %v1412_v35 = vor.u32 1.1754944e-38, %v1411_v32  ;;  %vm1410_vm5 = vcmp.eq.f32.partialorder %v1409_v34, 8.507059e+37 }
0x20b9   :  { %v1980_v25 = vpop.eup %1979 }
0x20ba   :  { %v1401_v0 = vmul.f32 %v1980_v25, %v1399_v31  ;;  %vm1406_vm2 = vweird.f32 %v1980_v25 }
0x20bb   :  { %vm1407_vm4 = vmor %vm1405_vm3, %vm1406_vm2 }
0x20bc   :  { %v1402_v4 = vsub.f32 1.0, %v1401_v0  ;;  %v1640_v0 = vpop.f32.mrf.mxu0 }
0x20be   :  { %v1403_v21 = vmul.f32 %v1980_v25, %v1402_v4 }
0x20c0   :  { %v1404_v17 = vadd.f32 %v1980_v25, %v1403_v21 }
0x20c2   :  { %v1408_v45 = vsel %vm1407_vm4, %v1980_v25, %v1404_v17  ;;  %v2594_v17 = vld [vmem:[%s2650_s12] ss:$0 sm:$0xff] }
0x20c3   :  { %v1413_v37 = vsel %vm1410_vm5, %v1412_v35, %v1408_v45  ;;  %v1641_v34 = vadd.f32 %v2594_v17, %v1640_v0 }
0x20c4   :  { %v1416_v40 = vmul.f32 %v1413_v37, %v1354_v16  ;;  %v1643_v4 = vpop.f32.mrf.mxu0 }
0x20cc   :  { %v1646_v21 = vpop.f32.mrf.mxu0 }
0x20d4   :  { %v1649_v32 = vpop.f32.mrf.mxu0 }
0x20dc   :  { %v1652_v45 = vpop.f32.mrf.mxu0 }
0x20dd   :  { %v1653_v35 = vadd.f32 %v2594_v17, %v1652_v45 }
0x2121   :  { %v1419_v41 = vpop.permute.xlu1 %1418 }
0x2122   :  { %v1421_v38 = vmul.f32 %v1419_v41, %v1413_v37 }
0x2124   :  { %1423 = vrot.lane.b32.xlu2 %v1421_v38, %s2035_s18 }
0x217e   :  { %v1424_v42 = vpop.permute.xlu2 %1423 }
0x217f   :  { %v1426_v44 = vadd.f32 %v1424_v42, %v1416_v40  ;;  %v1644_v42 = vadd.f32 %v2594_v17, %v1643_v4 }
0x2181   :  { %1981 = vtanh.f32 %v1426_v44 }
0x2187   :  { %v1982_v46 = vpop.eup %1981 }
0x2188   :  { %1429 = vrot.lane.b32.xlu0 %v1982_v46, %s2034_s3 }
0x21fa   :  { %v1430_v48 = vpop.permute.xlu0 %1429 }
0x21fb   :  { %v1432_v49 = vmul.f32 %v1430_v48, %v1413_v37 }
0x21fd   :  { %1434 = vrot.lane.b32.xlu1 %v1432_v49, %s2035_s18 }
0x226f   :  { %v1435_v36 = vpop.permute.xlu1 %1434 }
0x2270   :  { %1438 = vst.msk [vmem:[#allocation4 + $0x28] sm:$0xff] %vm413_vm13, %v1435_v36  ;;  %1841 = vmatmul.msk.f32.vlgmr.msra.gmra.mxu2 %vm413_vm13, %v1435_v36 }
0x2277   :  { %v1588_v50 = vld [vmem:[#allocation4 + $0x28] sm:$0xff] }
0x2278   :  { %1850 = vmatmul.msk.f32.gmra.mxu0 %vm413_vm13, %v1588_v50 }
0x22f3   :  { %v1464_v51 = vpop.f32.mrf.mxu2 }
0x22f4   :  { %v1467_v52 = vadd.f32 %v1464_v51, %v2401_v47 }
0x22f5   :  { %v1655_v49 = vpop.f32.mrf.mxu0 }
0x22f6   :  { %1983 = vtanh.f32 %v1467_v52  ;;  %v1842_v54 = vmul.f32 -1.442695, %v1467_v52  ;;  %v2602_v50 = vadd.f32 %v2594_v17, %v1655_v49 }
0x22f8   :  { %1985 = vpow2.f32 %v1842_v54  ;;  %v1647_v54 = vadd.f32 %v2594_v17, %v1646_v21 }
0x22fc   :  { %v1984_v53 = vpop.eup %1983 }
0x22fd   :  { %1490 = vrot.lane.b32.xlu2 %v1984_v53, %s2034_s3 }
0x22fe   :  { %v1986_v55 = vpop.eup %1985 }
0x22ff   :  { %v1471_v56 = vadd.f32 1.0, %v1986_v55 }
0x2301   :  { %1987 = vrcp.f32 %v1471_v56  ;;  %v1483_v63 = vand.u32 2147483648, %v1471_v56  ;;  %vm1477_vm7 = vweird.f32 %v1471_v56  ;;  %v1481_v23 = vand.u32 2147483647, %v1471_v56 }
0x2303   :  { %v1484_v1 = vor.u32 1.1754944e-38, %v1483_v63  ;;  %vm1482_vm9 = vcmp.eq.f32.partialorder %v1481_v23, 8.507059e+37 }
0x2307   :  { %v1988_v57 = vpop.eup %1987 }
0x2308   :  { %v1473_v58 = vmul.f32 %v1988_v57, %v1471_v56  ;;  %vm1478_vm6 = vweird.f32 %v1988_v57 }
0x2309   :  { %vm1479_vm8 = vmor %vm1477_vm7, %vm1478_vm6 }
0x230a   :  { %v1474_v27 = vsub.f32 1.0, %v1473_v58 }
0x230c   :  { %v1475_v59 = vmul.f32 %v1988_v57, %v1474_v27 }
0x230e   :  { %v1476_v61 = vadd.f32 %v1988_v57, %v1475_v59 }
0x2310   :  { %v1480_v47 = vsel %vm1479_vm8, %v1988_v57, %v1476_v61 }
0x2311   :  { %v1485_v2 = vsel %vm1482_vm9, %v1484_v1, %v1480_v47 }
0x2312   :  { %v1488_v5 = vmul.f32 %v1485_v2, %v1426_v44  ;;  %v1650_v44 = vadd.f32 %v2594_v17, %v1649_v32 }
0x2357   :  { %v1491_v19 = vpop.permute.xlu2 %1490 }
0x2358   :  { %v1493_v3 = vmul.f32 %v1491_v19, %v1485_v2 }
0x235a   :  { %1495 = vrot.lane.b32.xlu0 %v1493_v3, %s2035_s18 }
0x23cc   :  { %v1496_v6 = vpop.permute.xlu0 %1495 }
0x23cd   :  { %v1498_v7 = vadd.f32 %v1496_v6, %v1488_v5 }
0x23cf   :  { %1989 = vtanh.f32 %v1498_v7 }
0x23d5   :  { %v1990_v8 = vpop.eup %1989 }
0x23d6   :  { %1501 = vrot.lane.b32.xlu1 %v1990_v8, %s2034_s3 }
0x2448   :  { %v1502_v9 = vpop.permute.xlu1 %1501 }
0x2449   :  { %v1504_v43 = vmul.f32 %v1502_v9, %v1485_v2 }
0x244b   :  { %1506 = vrot.lane.b32.xlu2 %v1504_v43, %s2035_s18 }
0x24a5   :  { %v1507_v11 = vpop.permute.xlu2 %1506 }
0x24a6   :  { %1510 = vst.msk [vmem:[#allocation4 + $0x30] sm:$0xff] %vm413_vm13, %v1507_v11  ;;  %1843 = vmatmul.msk.f32.vlgmr.msra.gmra.mxu3 %vm413_vm13, %v1507_v11 }
0x24ad   :  { %v1589_v39 = vld [vmem:[#allocation4 + $0x30] sm:$0xff] }
0x24ae   :  { %1851 = vmatmul.msk.f32.gmra.mxu0 %vm413_vm13, %v1589_v39 }
0x2529   :  { %v1536_v13 = vpop.f32.mrf.mxu3 }
0x252a   :  { %v1539_v14 = vadd.f32 %v1536_v13, %v390_v12 }
0x252b   :  { %v1658_v55 = vpop.f32.mrf.mxu0 }
0x252c   :  { %1991 = vtanh.f32 %v1539_v14  ;;  %v1844_v16 = vmul.f32 -1.442695, %v1539_v14  ;;  %v1659_v56 = vadd.f32 %v2594_v17, %v1658_v55 }
0x252e   :  { %1993 = vpow2.f32 %v1844_v16 }
0x2532   :  { %v1992_v15 = vpop.eup %1991 }
0x2533   :  { %1562 = vrot.lane.b32.xlu0 %v1992_v15, %s2034_s3 }
0x2534   :  { %v1994_v18 = vpop.eup %1993 }
0x2535   :  { %v1543_v30 = vadd.f32 1.0, %v1994_v18 }
0x2537   :  { %1995 = vrcp.f32 %v1543_v30  ;;  %v1555_v60 = vand.u32 2147483648, %v1543_v30  ;;  %vm1549_vm11 = vweird.f32 %v1543_v30  ;;  %v1553_v33 = vand.u32 2147483647, %v1543_v30 }
0x2539   :  { %v1556_v28 = vor.u32 1.1754944e-38, %v1555_v60  ;;  %vm1554_vm14 = vcmp.eq.f32.partialorder %v1553_v33, 8.507059e+37 }
0x253d   :  { %v1996_v20 = vpop.eup %1995 }
0x253e   :  { %v1545_v22 = vmul.f32 %v1996_v20, %v1543_v30  ;;  %vm1550_vm10 = vweird.f32 %v1996_v20 }
0x253f   :  { %vm1551_vm12 = vmor %vm1549_vm11, %vm1550_vm10 }
0x2540   :  { %v1546_v24 = vsub.f32 1.0, %v1545_v22 }
0x2542   :  { %v1547_v26 = vmul.f32 %v1996_v20, %v1546_v24 }
0x2544   :  { %v1548_v29 = vadd.f32 %v1996_v20, %v1547_v26 }
0x2546   :  { %v1552_v10 = vsel %vm1551_vm12, %v1996_v20, %v1548_v29 }
0x2547   :  { %v1557_v31 = vsel %vm1554_vm14, %v1556_v28, %v1552_v10 }
0x2548   :  { %v1560_v41 = vmul.f32 %v1557_v31, %v1498_v7 }
0x25a5   :  { %v1563_v62 = vpop.permute.xlu0 %1562 }
0x25a6   :  { %v1565_v25 = vmul.f32 %v1563_v62, %v1557_v31 }
0x25a8   :  { %1567 = vrot.lane.b32.xlu1 %v1565_v25, %s2035_s18 }
0x25d2   :  { %1664 = vmax.xlane.f32.xlu1 %v1641_v34 }
0x25da   :  { %1672 = vmax.xlane.f32.xlu1 %v1653_v35 }
0x261a   :  { %v1568_v37 = vpop.permute.xlu1 %1567 }
0x261b   :  { %v1570_v38 = vadd.f32 %v1568_v37, %v1560_v41 }
0x261d   :  { %1997 = vtanh.f32 %v1570_v38 }
0x2623   :  { %v1998_v40 = vpop.eup %1997 }
0x2624   :  { %1573 = vrot.lane.b32.xlu2 %v1998_v40, %s2034_s3 }
0x2645   :  { %v1665_v46 = vpop.xlane.xlu1 %1664 }
0x2646   :  { %v1680_v48 = vsub.f32 %v1641_v34, %v1665_v46 }
0x2648   :  { %v1688_v36 = vmul.f32 1.442695, %v1680_v48 }
0x264a   :  { %1999 = vpow2.f32 %v1688_v36 }
0x264d   :  { %1666 = vmax.xlane.f32.xlu2 %v1644_v42  ;;  %v1673_v58 = vpop.xlane.xlu1 %1672 }
0x264e   :  { %v1684_v61 = vsub.f32 %v1653_v35, %v1673_v58 }
0x2650   :  { %v2000_v51 = vpop.eup %1999  ;;  %v1696_v63 = vmul.f32 1.442695, %v1684_v61 }
0x2655   :  { %1670 = vmax.xlane.f32.xlu2 %v1650_v44 }
0x265d   :  { %1674 = vmax.xlane.f32.xlu2 %v2602_v50 }
0x2665   :  { %1704 = vadd.xlane.f32.xlu2 %v2000_v51 }
0x267e   :  { %v1574_v52 = vpop.permute.xlu2 %1573 }
0x267f   :  { %v1576_v53 = vmul.f32 %v1574_v52, %v1557_v31 }
0x2681   :  { %1578 = vrot.lane.b32.xlu0 %v1576_v53, %s2035_s18 }
0x26ab   :  { %1668 = vmax.xlane.f32.xlu0 %v1647_v54 }
0x26b3   :  { %1676 = vmax.xlane.f32.xlu0 %v1659_v56 }
0x26c0   :  { %v1667_v57 = vpop.xlane.xlu2 %1666 }
0x26c1   :  { %v1681_v27 = vsub.f32 %v1644_v42, %v1667_v57 }
0x26c3   :  { %v1690_v59 = vmul.f32 1.442695, %v1681_v27 }
0x26c5   :  { %2001 = vpow2.f32 %v1690_v59 }
0x26c6   :  { %2003 = vpow2.f32 %v1696_v63 }
0x26c8   :  { %v1671_v23 = vpop.xlane.xlu2 %1670 }
0x26c9   :  { %v1683_v47 = vsub.f32 %v1650_v44, %v1671_v23 }
0x26cb   :  { %v2002_v1 = vpop.eup %2001  ;;  %v1694_v19 = vmul.f32 1.442695, %v1683_v47 }
0x26cc   :  { %1706 = vadd.xlane.f32.xlu0 %v2002_v1  ;;  %v2004_v3 = vpop.eup %2003 }
0x26cd   :  { %2005 = vpow2.f32 %v1694_v19 }
0x26d0   :  { %v1675_v2 = vpop.xlane.xlu2 %1674 }
0x26d1   :  { %v1685_v62 = vsub.f32 %v2602_v50, %v1675_v2 }
0x26d3   :  { %v2006_v5 = vpop.eup %2005  ;;  %v1698_v31 = vmul.f32 1.442695, %v1685_v62 }
0x26d4   :  { %1710 = vadd.xlane.f32.xlu2 %v2006_v5  ;;  %1712 = vadd.xlane.f32.xlu0 %v2004_v3 }
0x26d8   :  { %v1705_v6 = vpop.xlane.xlu2 %1704 }
0x26d9   :  { %2007 = vrcp.f32 %v1705_v6 }
0x26df   :  { %v2008_v7 = vpop.eup %2007 }
0x26e0   :  { %v1728_v8 = vmul.f32 %v2008_v7, %v2000_v51 }
0x26e2   :  { %1736 = vst [vmem:[%s2651_s13] sm:$0xff] %v1728_v8 }
0x26f3   :  { %v1579_v9 = vpop.permute.xlu0 %1578 }
0x26f4   :  { %1582 = vst.msk [vmem:[#allocation4 + $0x38] sm:$0xff] %vm413_vm13, %v1579_v9 }
0x26fb   :  { %v1590_v43 = vld [vmem:[#allocation4 + $0x38] sm:$0xff] }
0x26fc   :  { %1852 = vmatmul.msk.f32.gmra.mxu0 %vm413_vm13, %v1590_v43 }
0x271e   :  { %v1669_v11 = vpop.xlane.xlu0 %1668 }
0x271f   :  { %v1682_v60 = vsub.f32 %v1647_v54, %v1669_v11 }
0x2721   :  { %v1692_v33 = vmul.f32 1.442695, %v1682_v60 }
0x2726   :  { %v1677_v39 = vpop.xlane.xlu0 %1676 }
0x2727   :  { %v1686_v12 = vsub.f32 %v1659_v56, %v1677_v39 }
0x2729   :  { %v1700_v13 = vmul.f32 1.442695, %v1686_v12 }
0x272b   :  { %2009 = vpow2.f32 %v1700_v13 }
0x2731   :  { %v2010_v14 = vpop.eup %2009 }
0x2732   :  { %1716 = vadd.xlane.f32.xlu2 %v2010_v14 }
0x273f   :  { %v1707_v15 = vpop.xlane.xlu0 %1706 }
0x2740   :  { %2011 = vrcp.f32 %v1707_v15 }
0x2746   :  { %v2012_v16 = vpop.eup %2011 }
0x2747   :  { %v1729_v18 = vmul.f32 %v2012_v16, %v2002_v1  ;;  %v1711_v30 = vpop.xlane.xlu2 %1710  ;;  %v1713_v20 = vpop.xlane.xlu0 %1712 }
0x2748   :  { %2013 = vrcp.f32 %v1711_v30 }
0x2749   :  { %1737 = vst [vmem:[%s2651_s13 + $0x8] sm:$0xff] %v1729_v18  ;;  %2015 = vrcp.f32 %v1713_v20 }
0x274a   :  { %2017 = vpow2.f32 %v1692_v33 }
0x274b   :  { %2019 = vpow2.f32 %v1698_v31 }
0x274e   :  { %v2014_v22 = vpop.eup %2013 }
0x274f   :  { %v2016_v24 = vpop.eup %2015  ;;  %v1731_v26 = vmul.f32 %v2014_v22, %v2006_v5 }
0x2750   :  { %v1732_v29 = vmul.f32 %v2016_v24, %v2004_v3  ;;  %v2018_v25 = vpop.eup %2017 }
0x2751   :  { %1739 = vst [vmem:[%s2651_s13 + $0x18] sm:$0xff] %v1731_v26  ;;  %v2020_v0 = vpop.eup %2019 }
0x2752   :  { %1740 = vst [vmem:[%s2651_s13 + $0x20] sm:$0xff] %v1732_v29 }
0x2779   :  { %v1661_v10 = vpop.f32.mrf.mxu0 }
0x277a   :  { %v1662_v28 = vadd.f32 %v2594_v17, %v1661_v10 }
0x277c   :  { %1678 = vmax.xlane.f32.xlu1 %v1662_v28 }
0x2784   :  { %1708 = vadd.xlane.f32.xlu1 %v2018_v25 }
0x278c   :  { %1714 = vadd.xlane.f32.xlu1 %v2020_v0 }
0x27a5   :  { %v1717_v4 = vpop.xlane.xlu2 %1716 }
0x27a6   :  { %2021 = vrcp.f32 %v1717_v4 }
0x27ac   :  { %v2022_v21 = vpop.eup %2021 }
0x27ad   :  { %v1734_v32 = vmul.f32 %v2022_v21, %v2010_v14 }
0x27af   :  { %1742 = vst [vmem:[%s2651_s13 + $0x30] sm:$0xff] %v1734_v32 }
0x27ef   :  { %v1679_v34 = vpop.xlane.xlu1 %1678 }
0x27f0   :  { %v1687_v17 = vsub.f32 %v1662_v28, %v1679_v34 }
0x27f2   :  { %v1702_v45 = vmul.f32 1.442695, %v1687_v17 }
0x27f4   :  { %2023 = vpow2.f32 %v1702_v45 }
0x27f7   :  { %v1709_v35 = vpop.xlane.xlu1 %1708 }
0x27f8   :  { %2025 = vrcp.f32 %v1709_v35 }
0x27fa   :  { %v2024_v41 = vpop.eup %2023 }
0x27fb   :  { %1718 = vadd.xlane.f32.xlu0 %v2024_v41 }
0x27fe   :  { %v2026_v37 = vpop.eup %2025 }
0x27ff   :  { %v1730_v38 = vmul.f32 %v2026_v37, %v2018_v25  ;;  %v1715_v40 = vpop.xlane.xlu1 %1714 }
0x2800   :  { %2027 = vrcp.f32 %v1715_v40 }
0x2801   :  { %1738 = vst [vmem:[%s2651_s13 + $0x10] sm:$0xff] %v1730_v38 }
0x2806   :  { %v2028_v42 = vpop.eup %2027 }
0x2807   :  { %v1733_v44 = vmul.f32 %v2028_v42, %v2020_v0 }
0x2809   :  { %1741 = vst [vmem:[%s2651_s13 + $0x28] sm:$0xff] %v1733_v44 }
0x286e   :  { %v1719_v46 = vpop.xlane.xlu0 %1718 }
0x286f   :  { %2029 = vrcp.f32 %v1719_v46 }
0x2875   :  { %v2030_v48 = vpop.eup %2029 }
0x2876   :  { %v1735_v49 = vmul.f32 %v2030_v48, %v2024_v41 }
0x2878   :  { %1743 = vst [vmem:[%s2651_s13 + $0x38] sm:$0xff] %v1735_v49 }

</bundles_post_ra>
